<compile_context>
chip_gen: v7x
topology: tpu7x:2x2x1
jax: 0.10.0
libtpu: 0.0.40
codegen_flags: <defaults>
</compile_context>

<pallas_src>
import functools

import jax
import jax.numpy as jnp
from jax import lax
from jax.experimental import pallas as pl
from jax.experimental.pallas import tpu as pltpu


def _inner_product_decoder_kernel(zi_ref, zj_ref, o_ref):
    # zi_ref: (tm, D) row-block of z
    # zj_ref: (tn, D) row-block of z acting as the column block of z.T
    # o_ref : (tm, tn) block of the reconstructed adjacency
    #
    # Contract the last dim of both operands directly (no explicit transpose),
    # accumulate in f32 on the MXU at highest precision (negligible cost; this
    # kernel is writeback-bound, not MXU-bound).
    s = lax.dot_general(
        zi_ref[...],
        zj_ref[...],
        dimension_numbers=(((1,), (1,)), ((), ())),
        preferred_element_type=jnp.float32,
        precision=lax.Precision.HIGHEST,
    )
    # sigmoid(x) == 0.5 * tanh(0.5 * x) + 0.5  -> one EUP op per element.
    o_ref[...] = (0.5 * jnp.tanh(0.5 * s) + 0.5).astype(o_ref.dtype)


def _round_up(x, m):
    return ((x + m - 1) // m) * m


@functools.partial(jax.jit, static_argnames=("tm", "tn", "out_dtype"))
def inner_product_decoder(z, *, tm=1024, tn=1024, out_dtype=jnp.float32):
    """sigmoid(z @ z.T) via a tiled Pallas TPU kernel.

    z: [n_nodes, n_features] float32
    returns: [n_nodes, n_nodes] out_dtype (default float32, matching PyTorch).
    """
    n, d = z.shape

    # Clamp tiles to the (128-aligned) problem size so small graphs don't pay
    # for huge padded tiles; keep tiles multiples of 128 for lane-dense stores.
    n_128 = _round_up(max(n, 1), 128)
    tm_eff = min(_round_up(tm, 128), n_128)
    tn_eff = min(_round_up(tn, 128), n_128)

    # Make sure the grid has at least 2 row blocks whenever possible so both
    # TensorCores get work on v7x (dimension_semantics is fully parallel).
    if n_128 >= 256 and pl.cdiv(n, tm_eff) < 2:
        tm_eff = _round_up(n_128 // 2, 128)

    grid = (pl.cdiv(n, tm_eff), pl.cdiv(n, tn_eff))

    # Pad z's row dimension (only) so every input block read is fully
    # in-bounds; this is O(n_pad * d) bytes, negligible next to the N^2
    # output.  The OUTPUT is left at its exact (n, n) shape: Pallas masks the
    # ragged edge-block stores, so no post-kernel slice / extra HBM round-trip.
    rows_needed = max(grid[0] * tm_eff, grid[1] * tn_eff)
    if rows_needed != n:
        z_p = jnp.pad(z, ((0, rows_needed - n), (0, 0)))
    else:
        z_p = z

    # VMEM budget: double-buffered output tile + double-buffered input tiles,
    # plus slack.  1024x1024 f32 output -> ~8 MiB double-buffered, well inside
    # the scoped limit on v5e/v6e/v7x once we set it explicitly.
    out_itemsize = jnp.dtype(out_dtype).itemsize
    in_itemsize = jnp.dtype(z.dtype).itemsize
    vmem_bytes = 2 * tm_eff * tn_eff * out_itemsize
    vmem_bytes += 2 * (tm_eff + tn_eff) * d * in_itemsize
    vmem_bytes = int(max(vmem_bytes + (4 << 20), 24 << 20))

    out = pl.pallas_call(
        _inner_product_decoder_kernel,
        out_shape=jax.ShapeDtypeStruct((n, n), out_dtype),
        grid_spec=pltpu.PrefetchScalarGridSpec(
            num_scalar_prefetch=0,
            grid=grid,
            in_specs=[
                # row-block of z for output rows i
                pl.BlockSpec((tm_eff, d), lambda i, j: (i, 0)),
                # row-block of z for output cols j (columns of z.T)
                pl.BlockSpec((tn_eff, d), lambda i, j: (j, 0)),
            ],
            out_specs=pl.BlockSpec((tm_eff, tn_eff), lambda i, j: (i, j)),
        ),
        compiler_params=pltpu.CompilerParams(
            # Both axes independent -> megacore / dual-TC sharding on v7x.
            dimension_semantics=("parallel", "parallel"),
            vmem_limit_bytes=vmem_bytes,
        ),
    )(z_p, z_p)

    return out


if __name__ == "__main__":
    # InnerProductDecoder has no learnable parameters; only dropout prob & act.
    # Inference semantics: dropout is identity (training=False).
    # TODO(synk): training-mode dropout (stochastic masking) not implemented;
    # eval-mode forward is reproduced exactly.
    key = jax.random.PRNGKey(0)
    n_nodes, n_features = 256, 64  # small synthetic latent features
    z = jax.random.normal(key, (n_nodes, n_features), dtype=jnp.float32)

    out = inner_product_decoder(z)
    out = jax.block_until_ready(out)

    # sanity check against plain-JAX reference
    ref = jax.nn.sigmoid(z @ z.T)
    assert out.shape == (n_nodes, n_nodes)
    assert jnp.allclose(out, ref, atol=1e-5, rtol=1e-5)

    # also exercise a non-128-divisible node count (ragged edge blocks, no
    # post-kernel slice)
    n2 = 200
    z2 = jax.random.normal(jax.random.PRNGKey(1), (n2, n_features), jnp.float32)
    out2 = jax.block_until_ready(inner_product_decoder(z2))
    ref2 = jax.nn.sigmoid(z2 @ z2.T)
    assert out2.shape == (n2, n2)
    assert jnp.allclose(out2, ref2, atol=1e-5, rtol=1e-5)

    # and a multi-block ragged case (partial tiles in both grid axes)
    n3 = 300
    z3 = jax.random.normal(jax.random.PRNGKey(2), (n3, n_features), jnp.float32)
    out3 = jax.block_until_ready(inner_product_decoder(z3))
    ref3 = jax.nn.sigmoid(z3 @ z3.T)
    assert out3.shape == (n3, n3)
    assert jnp.allclose(out3, ref3, atol=1e-5, rtol=1e-5)

    print("KERNEL_OK")
</pallas_src>

<mosaic_0001>
module attributes {stable_mosaic.version = 11 : i64} {
  func.func @_inner_product_decoder_kernel(%arg0: i32, %arg1: i32, %arg2: memref<128x64xf32, #tpu.memory_space<vmem>>, %arg3: memref<256x64xf32, #tpu.memory_space<vmem>>, %arg4: memref<128x256xf32, #tpu.memory_space<vmem>>) attributes {dimension_semantics = [#tpu.dimension_semantics<parallel>, #tpu.dimension_semantics<parallel>], iteration_bounds = array<i64: 2, 1>, scalar_prefetch = 0 : i64, scratch_operands = 0 : i64, tpu.core_type = #tpu.core_type<tc>, window_params = [{transform_indices = @transform_0, window_bounds = array<i64: 128, 64>}, {transform_indices = @transform_1, window_bounds = array<i64: 256, 64>}, {transform_indices = @transform_2, window_bounds = array<i64: 128, 256>}]} {
    %c0 = arith.constant 0 : index
    %c0_0 = arith.constant 0 : index
    %0 = vector.load %arg2[%c0, %c0_0] : memref<128x64xf32, #tpu.memory_space<vmem>>, vector<128x64xf32>
    %c0_1 = arith.constant 0 : index
    %c0_2 = arith.constant 0 : index
    %1 = vector.load %arg3[%c0_1, %c0_2] : memref<256x64xf32, #tpu.memory_space<vmem>>, vector<256x64xf32>
    %cst = arith.constant dense<0.000000e+00> : vector<128x256xf32>
    %2 = tpu.matmul %0, %1, %cst {dimension_numbers = #tpu.dot_dimension_numbers<[1], [1], [0], [0], [0, 0, 1, 0], [], []>, precision = #tpu.contract_precision<fp32>} : vector<128x64xf32>, vector<256x64xf32>, vector<128x256xf32> -> vector<128x256xf32>
    %cst_3 = arith.constant 5.000000e-01 : f32
    %3 = vector.broadcast %cst_3 : f32 to vector<128x256xf32>
    %4 = arith.mulf %3, %2 : vector<128x256xf32>
    %5 = math.tanh %4 : vector<128x256xf32>
    %cst_4 = arith.constant 5.000000e-01 : f32
    %6 = vector.broadcast %cst_4 : f32 to vector<128x256xf32>
    %7 = arith.mulf %6, %5 : vector<128x256xf32>
    %cst_5 = arith.constant 5.000000e-01 : f32
    %8 = vector.broadcast %cst_5 : f32 to vector<128x256xf32>
    %9 = arith.addf %7, %8 : vector<128x256xf32>
    %c0_6 = arith.constant 0 : index
    %c0_7 = arith.constant 0 : index
    %10 = vector.load %arg4[%c0_6, %c0_7] : memref<128x256xf32, #tpu.memory_space<vmem>>, vector<128x256xf32>
    tpu.vector_store %arg4[%c0_6, %c0_7], %9 {strides = array<i32>} : memref<128x256xf32, #tpu.memory_space<vmem>>, vector<128x256xf32>,
    return
  }
  func.func @transform_0(%arg0: i32, %arg1: i32) -> (i32, i32) {
    %c0_i32 = arith.constant 0 : i32
    %c0_i32_0 = arith.constant 0 : i32
    return %arg0, %c0_i32 : i32, i32
  }
  func.func @transform_1(%arg0: i32, %arg1: i32) -> (i32, i32) {
    %c0_i32 = arith.constant 0 : i32
    %c0_i32_0 = arith.constant 0 : i32
    return %arg1, %c0_i32 : i32, i32
  }
  func.func @transform_2(%arg0: i32, %arg1: i32) -> (i32, i32) {
    %c0_i32 = arith.constant 0 : i32
    return %arg0, %arg1 : i32, i32
  }
}

</mosaic_0001>

<bundles_post_ra>
// kernel: inner_product_decoder.1
= control target key start
LH: loop header
LB: loop body
LE: loop exit
PB: predicated region body
PF: predicated region fallthrough
CT: control target
= control target key end

     0   :  { %7 = vsyncpa [#allocation3], 0  ;;  %s4362_s0 = inlined_call_operand.vmem [shape: f32[256,64], index: 0, kind: input, shape index: {}, may-alias: {0,1}]   ;;  %s4363_s1 = inlined_call_operand.vmem [shape: f32[256,64], index: 1, kind: input, shape index: {}, may-alias: {0,1}]   ;;  %s4364_s2 = inlined_call_operand.hbm [shape: f32[256,256], index: 2, kind: output, shape index: {}]  }
   0x1   :  { %9 = vsyncpa [#allocation3 + $0x1], 0  ;;  %s3202_s9 = smov 0   ;;  %s3204_s10 = smov 0  }
   0x2   :  { %s3206_s11 = smov 0   ;;  %s3208_s12 = smov 0  }
   0x3   :  { %s3210_s13 = smov 0   ;;  %s3212_s14 = smov 0  }
   0x4 LB: > { %s2230_s15 = sadd.s32 4294967295, %s3182_s14   ;;  %s2231_s16 = sadd.s32 4294967294, %s3182_s14   ;;  %s3182_s14 = sphi %s3212_s14, %s15_s14   ;;  %s3178_s13 = sphi %s3210_s13, %s4605_s13   ;;  %s3174_s12 = sphi %s3208_s12, %s4604_s12   ;;  %s3170_s11 = sphi %s3206_s11, %s4603_s11   ;;  %s3166_s10 = sphi %s3204_s10, %s4602_s10   ;;  %s3162_s9 = sphi %s3202_s9, %s4601_s9  }
   0x5   : > { %s27_s17 = sadd.s32 1, %s3178_s13  ;;  %s88_s18 = sadd.s32 1, %s3170_s11 }
   0x6   : > { %p29_p0 = scmp.ge.s32.totalorder %s27_s17, 2  ;;  %p98_p1 = scmp.ne.s32.totalorder %s3170_s11, %s3166_s10 }
   0x7   : > { %p99_p2 = scmp.eq.s32.totalorder %s2230_s15, 1  ;;  %p104_p3 = scmp.ne.s32.totalorder %s3166_s10, %s3162_s9 }
   0x8   : > { %s4607_s17 = smov (%p29_p0, %s27_s17), 0  ;;  %p105_p5 = scmp.eq.s32.totalorder %s2231_s16, 1 }
   0x9   : > { %p3242_p4 = por %p99_p2, %p98_p1  ;;  %s83_s20 = ssub.s32 %s3178_s13, %s4607_s17 }
   0xa   : > { %p2235_p6 = scmp.ge.s32.totalorder %s3182_s14, 1  ;;  %p86_p7 = scmp.eq.s32.totalorder %s83_s20, 0 }
   0xb   : > { %p3249_p8 = por %p105_p5, %p104_p3  ;;  %p141_p9 = scmp.lt.s32.totalorder %s3182_s14, 3 }
   0xc   : > { %s3255_s22 = scalar_select %p86_p7, %s3170_s11, %s88_s18  }
   0xd   : > { %p142_p10 = pnand %p2235_p6, %p141_p9 }
   0xf   : > { %145 = sbr.rel (%p142_p10) target bundleno = 528 (0x210), region = 28 }
  0x16   : > { %v214_v0 = vld [vmem:[%s4363_s1 + $0x80] sm:$0xff]  ;;  %v215_v1 = vld [vmem:[%s4363_s1 + $0x88] sm:$0xff]  ;;  %vm230_vm0 = vcmask 523264   ;;  %v216_v7 = vld [vmem:[%s4363_s1 + $0x90] sm:$0xff]  ;;  %s2237_s25 = sshll.u32 %s3174_s12, 4  ;;  %s2246_s23 = sshll.u32 %s3174_s12, 12 }
  0x17   : > { %v198_v2 = vld [vmem:[%s4363_s1] sm:$0xff]  ;;  %v3267_v3 = vsel %vm230_vm0, %v214_v0, 0  ;;  %v3270_v4 = vsel %vm230_vm0, %v215_v1, 0  ;;  %v199_v5 = vld [vmem:[%s4363_s1 + $0x8] sm:$0xff]  ;;  %v217_v8 = vld [vmem:[%s4363_s1 + $0x98] sm:$0xff]  ;;  %v3295_v15 = vsel %vm230_vm0, %v216_v7, 0  ;;  %s4308_s28 = scalar_lea.hbm %s4364_s2, %s2246_s23 }
  0x18   : > { %v3276_v6 = vsel %vm230_vm0, %v198_v2, 0  ;;  %v424_v9 = vand.u32 4294901760, %v3267_v3  ;;  %v427_v10 = vand.u32 4294901760, %v3270_v4  ;;  %v3287_v11 = vsel %vm230_vm0, %v199_v5, 0  ;;  %v200_v13 = vld [vmem:[%s4363_s1 + $0x10] sm:$0xff]  ;;  %v201_v17 = vld [vmem:[%s4363_s1 + $0x18] sm:$0xff] }
  0x19   : > { %v376_v12 = vand.u32 4294901760, %v3276_v6  ;;  %v379_v14 = vand.u32 4294901760, %v3287_v11  ;;  %v3298_v16 = vsel %vm230_vm0, %v217_v8, 0  ;;  %v218_v18 = vld [vmem:[%s4363_s1 + $0xa0] sm:$0xff]  ;;  %v219_v19 = vld [vmem:[%s4363_s1 + $0xa8] sm:$0xff]  ;;  %v3316_v21 = vsel %vm230_vm0, %v200_v13, 0 }
  0x1a   : > { %v3313_v20 = vpack.c.bf16 %v427_v10, %v424_v9  ;;  %v430_v23 = vand.u32 4294901760, %v3295_v15  ;;  %v433_v24 = vand.u32 4294901760, %v3298_v16  ;;  %v3329_v25 = vsel %vm230_vm0, %v201_v17, 0  ;;  %v202_v33 = vld [vmem:[%s4363_s1 + $0x20] sm:$0xff]  ;;  %v203_v34 = vld [vmem:[%s4363_s1 + $0x28] sm:$0xff]  ;;  %v220_v35 = vld [vmem:[%s4363_s1 + $0xb0] sm:$0xff] }
  0x1b   : > { %v3322_v22 = vpack.c.bf16 %v379_v14, %v376_v12  ;;  %v3332_v26 = vsel %vm230_vm0, %v218_v18, 0  ;;  %v3335_v27 = vsel %vm230_vm0, %v219_v19, 0  ;;  %v382_v29 = vand.u32 4294901760, %v3316_v21  ;;  %v221_v36 = vld [vmem:[%s4363_s1 + $0xb8] sm:$0xff]  ;;  %p169_p11 = scmp.lt.s32.totalorder %s2237_s25, 31  ;;  %v204_v47 = vld [vmem:[%s4363_s1 + $0x30] sm:$0xff] }
  0x1c   : > { %4456 = vst [vmem:[#allocation5_spill] sm:$0xff] %v3313_v20  ;;  %2632 = vmatprep.subr.bf16.mxu1 %v3313_v20  ;;  %2728 = vmatprep.subr.bf16.mxu0 %v3313_v20  ;;  %v3343_v28 = vpack.c.bf16 %v433_v24, %v430_v23  ;;  %v385_v30 = vand.u32 4294901760, %v3329_v25  ;;  %v436_v31 = vand.u32 4294901760, %v3332_v26  ;;  %v439_v32 = vand.u32 4294901760, %v3335_v27  ;;  %v205_v48 = vld [vmem:[%s4363_s1 + $0x38] sm:$0xff]  ;;  %v222_v49 = vld [vmem:[%s4363_s1 + $0xc0] sm:$0xff] }
  0x1d   : > { %4457 = vst [vmem:[#allocation6_spill] sm:$0xff] %v3322_v22  ;;  %2634 = vmatpush3.bf16.xpose.msra.mxu1 %v3322_v22  ;;  %2730 = vmatpush3.bf16.xpose.msra.mxu0 %v3322_v22  ;;  %v3377_v39 = vsel %vm230_vm0, %v202_v33, 0  ;;  %v3380_v40 = vsel %vm230_vm0, %v203_v34, 0  ;;  %v3383_v41 = vsel %vm230_vm0, %v220_v35, 0  ;;  %v3386_v42 = vsel %vm230_vm0, %v221_v36, 0  ;;  %s4609_s25 = smov (!%p169_p11, %s2237_s25), 31 }
  0x1e   : > { %4458 = vst [vmem:[#allocation7_spill] sm:$0xff] %v3343_v28  ;;  %2636 = vmatprep.subr.bf16.mxu1 %v3343_v28  ;;  %2732 = vmatprep.subr.bf16.mxu0 %v3343_v28  ;;  %v3368_v37 = vpack.c.bf16 %v385_v30, %v382_v29  ;;  %v3374_v38 = vpack.c.bf16 %v439_v32, %v436_v31  ;;  %v388_v43 = vand.u32 4294901760, %v3377_v39  ;;  %v4375_v44 = vand.u32 4294901760, %v3380_v40  ;;  %v223_v50 = vld [vmem:[%s4363_s1 + $0xc8] sm:$0xff]  ;;  %s2238_s24 = sshll.u32 %s4609_s25, 3  ;;  %v206_v62 = vld [vmem:[%s4363_s1 + $0x40] sm:$0xff] }
  0x1f   : > { %v4374_v45 = vand.u32 4294901760, %v3383_v41  ;;  %v4373_v46 = vand.u32 4294901760, %v3386_v42  ;;  %v3421_v53 = vsel %vm230_vm0, %v204_v47, 0  ;;  %v3424_v54 = vsel %vm230_vm0, %v205_v48, 0  ;;  %s3435_s27 = scalar_lea.vmem %s4362_s0, %s2238_s24  ;;  %v207_v63 = vld [vmem:[%s4363_s1 + $0x48] sm:$0xff]  ;;  %v224_v0 = vld [vmem:[%s4363_s1 + $0xd0] sm:$0xff] }
  0x20   : > { %4459 = vst [vmem:[#allocation8_spill] sm:$0xff] %v3368_v37  ;;  %4460 = vst [vmem:[#allocation9_spill] sm:$0xff] %v3374_v38  ;;  %v3412_v51 = vpack.c.bf16 %v4375_v44, %v388_v43  ;;  %v3427_v55 = vsel %vm230_vm0, %v222_v49, 0  ;;  %v3430_v56 = vsel %vm230_vm0, %v223_v50, 0  ;;  %v4372_v57 = vand.u32 4294901760, %v3421_v53  ;;  %v182_v61 = vld [vmem:[%s3435_s27] sm:$0xff] }
  0x21   : > { %v3418_v52 = vpack.c.bf16 %v4373_v46, %v4374_v45  ;;  %v4371_v58 = vand.u32 4294901760, %v3424_v54  ;;  %v4368_v59 = vand.u32 4294901760, %v3427_v55  ;;  %v4365_v60 = vand.u32 4294901760, %v3430_v56  ;;  %v225_v1 = vld [vmem:[%s4363_s1 + $0xd8] sm:$0xff]  ;;  %v208_v48 = vld [vmem:[%s4363_s1 + $0x50] sm:$0xff]  ;;  %v187_v28 = vld [vmem:[%s3435_s27 + $0x28] sm:$0xff] }
  0x22   : > { %4461 = vst [vmem:[#allocation10_spill] sm:$0xff] %v3412_v51  ;;  %v232_v5 = vsel %vm230_vm0, %v182_v61, 0  ;;  %v3472_v8 = vsel %vm230_vm0, %v206_v62, 0  ;;  %v3475_v13 = vsel %vm230_vm0, %v207_v63, 0  ;;  %v3478_v17 = vsel %vm230_vm0, %v224_v0, 0  ;;  %v209_v49 = vld [vmem:[%s4363_s1 + $0x58] sm:$0xff] }
  0x23   : > { %4462 = vst [vmem:[#allocation11_spill] sm:$0xff] %v3418_v52  ;;  %v3462_v2 = vpack.c.bf16 %v4371_v58, %v4372_v57  ;;  %v3469_v7 = vpack.c.bf16 %v4365_v60, %v4368_v59  ;;  %v3481_v18 = vsel %vm230_vm0, %v225_v1, 0  ;;  %v3483_v19 = vand.u32 4294901760, %v232_v5  ;;  %v226_v61 = vld [vmem:[%s4363_s1 + $0xe0] sm:$0xff]  ;;  %v227_v62 = vld [vmem:[%s4363_s1 + $0xe8] sm:$0xff]  ;;  %v228_v58 = vld [vmem:[%s4363_s1 + $0xf0] sm:$0xff] }
  0x24   : > { %v4367_v33 = vand.u32 4294901760, %v3472_v8  ;;  %v4366_v34 = vand.u32 4294901760, %v3475_v13  ;;  %v4370_v36 = vand.u32 4294901760, %v3478_v17  ;;  %v4369_v47 = vand.u32 4294901760, %v3481_v18  ;;  %v229_v57 = vld [vmem:[%s4363_s1 + $0xf8] sm:$0xff]  ;;  %v188_v22 = vld [vmem:[%s3435_s27 + $0x30] sm:$0xff] }
  0x25   : > { %2638 = vmatpush3.bf16.xpose.msra.mxu1 %v3368_v37  ;;  %2734 = vmatpush3.bf16.xpose.msra.mxu0 %v3368_v37  ;;  %4463 = vst [vmem:[#allocation12_spill] sm:$0xff] %v3462_v2  ;;  %4464 = vst [vmem:[#allocation13_spill] sm:$0xff] %v3469_v7  ;;  %v3490_v35 = vsub.f32 %v232_v5, %v3483_v19  ;;  %v3527_v5 = vsel %vm230_vm0, %v208_v48, 0  ;;  %v3530_v60 = vsel %vm230_vm0, %v209_v49, 0  ;;  %s3184_s30 = smov [#allocation2]  }
  0x26   : > { %2640 = vmatprep.subr.bf16.mxu1 %v3374_v38  ;;  %2736 = vmatprep.subr.bf16.mxu0 %v3374_v38  ;;  %4465 = vst [vmem:[#allocation14_spill] sm:$0xff] %v3483_v19  ;;  %v3515_v63 = vpack.c.bf16 %v4366_v34, %v4367_v33  ;;  %v3524_v1 = vpack.c.bf16 %v4369_v47, %v4370_v36  ;;  %v3533_v34 = vsel %vm230_vm0, %v226_v61, 0  ;;  %v3536_v33 = vsel %vm230_vm0, %v227_v62, 0  ;;  %v210_v62 = vld [vmem:[%s4363_s1 + $0x60] sm:$0xff]  ;;  %s3108_s3 = sshll.u32 %s3184_s30, 4  ;;  %s3109_s3 = int_to_ptr.vmem [resolvable:$false] %s3108_s3 }
  0x27   : > { %4466 = vst [vmem:[#allocation15_spill] sm:$0xff] %v3490_v35  ;;  %v3503_v50 = vand.u32 4294901760, %v3490_v35  ;;  %v406_v47 = vand.u32 4294901760, %v3527_v5  ;;  %v409_v48 = vand.u32 4294901760, %v3530_v60  ;;  %v460_v49 = vand.u32 4294901760, %v3533_v34  ;;  %s3110_s4 = scalar_lea.vmem %s3109_s3, 8192 }
  0x28   : > { %4467 = vst [vmem:[#allocation16_spill] sm:$0xff] %v3515_v63  ;;  %4468 = vst [vmem:[#allocation17_spill] sm:$0xff] %v3524_v1  ;;  %v4376_v61 = vand.u32 4294901760, %v3536_v33  ;;  %v3558_v36 = vsub.f32 %v3267_v3, %v424_v9  ;;  %v3569_v46 = vsub.f32 %v3270_v4, %v427_v10  ;;  %v3574_v45 = vsub.f32 %v3276_v6, %v376_v12 }
  0x29   : > { %v475_v0 = vsub.f32 %v3490_v35, %v3503_v50  ;;  %2471 = vmatprep.mubr.f32.mxu0 %v3503_v50  ;;  %v3579_v3 = vsub.f32 %v3287_v11, %v379_v14  ;;  %v3581_v9 = vpack.c.bf16 %v409_v48, %v406_v47  ;;  %v3586_v44 = vsub.f32 %v3295_v15, %v430_v23 }
  0x2a   : > { %v3590_v4 = vpack.c.bf16 %v4376_v61, %v460_v49  ;;  %v316_v10 = vsel %vm230_vm0, %v210_v62, 0  ;;  %v3597_v11 = vsub.f32 %v3298_v16, %v433_v24  ;;  %v3602_v12 = vsub.f32 %v3316_v21, %v382_v29  ;;  %v183_v29 = vld [vmem:[%s3435_s27 + $0x8] sm:$0xff]  ;;  %v184_v62 = vld [vmem:[%s3435_s27 + $0x10] sm:$0xff] }
  0x2b   : > { %v3538_v59 = vand.u32 4294901760, %v475_v0  ;;  %v211_v0 = vld [vmem:[%s4363_s1 + $0x68] sm:$0xff]  ;;  %4469 = vst [vmem:[#allocation18_spill] sm:$0xff] %v3581_v9  ;;  %v370_v14 = vsel %vm230_vm0, %v228_v58, 0  ;;  %v3606_v15 = vsel %vm230_vm0, %v229_v57, 0  ;;  %v3611_v23 = vsub.f32 %v3329_v25, %v385_v30 }
  0x2c   : > { %4470 = vst [vmem:[#allocation19_spill] sm:$0xff] %v3590_v4  ;;  %v319_v6 = vsel %vm230_vm0, %v211_v0, 0  ;;  %v3616_v16 = vsub.f32 %v3332_v26, %v436_v31  ;;  %v3621_v21 = vsub.f32 %v3335_v27, %v439_v32  ;;  %v3626_v24 = vsub.f32 %v3377_v39, %v388_v43  ;;  %v212_v39 = vld [vmem:[%s4363_s1 + $0x70] sm:$0xff] }
  0x2d   : > { %2642 = vmatpush3.bf16.xpose.msra.mxu1 %v3412_v51  ;;  %2738 = vmatpush3.bf16.xpose.msra.mxu0 %v3412_v51  ;;  %v4471_v25 = vand.u32 4294901760, %v3380_v40  ;;  %v4472_v26 = vand.u32 4294901760, %v3383_v41  ;;  %v412_v27 = vand.u32 4294901760, %v316_v10  ;;  %v415_v32 = vand.u32 4294901760, %v319_v6 }
  0x2e   : > { %2644 = vmatprep.subr.bf16.mxu1 %v3418_v52  ;;  %2740 = vmatprep.subr.bf16.mxu0 %v3418_v52  ;;  %v469_v43 = vand.u32 4294901760, %v3606_v15  ;;  %v763_v57 = vand.u32 4294901760, %v3558_v36  ;;  %v770_v58 = vand.u32 4294901760, %v3569_v46  ;;  %v4473_v0 = vand.u32 4294901760, %v3386_v42 }
  0x2f   : > { %2279 = vmatprep.mubr.f32.mxu1 %v3538_v59  ;;  %v3632_v30 = vsub.f32 %v3380_v40, %v4471_v25  ;;  %v3637_v31 = vsub.f32 %v3383_v41, %v4472_v26  ;;  %v466_v40 = vand.u32 4294901760, %v370_v14  ;;  %v213_v41 = vld [vmem:[%s4363_s1 + $0x78] sm:$0xff]  ;;  %v4474_v26 = vand.u32 4294901760, %v3421_v53 }
  0x30   : > { %v3656_v25 = vsub.f32 %v3386_v42, %v4473_v0  ;;  %v4475_v35 = vand.u32 4294901760, %v3424_v54  ;;  %v4477_v42 = vand.u32 4294901760, %v3430_v56  ;;  %v3717_v52 = vsub.f32 %v3533_v34, %v460_v49 }
  0x31   : > { %v3661_v61 = vsub.f32 %v3421_v53, %v4474_v26  ;;  %v4478_v53 = vand.u32 4294901760, %v3472_v8  ;;  %v651_v51 = vand.u32 4294901760, %v3574_v45  ;;  %v658_v38 = vand.u32 4294901760, %v3579_v3 }
  0x32   : > { %v3677_v0 = vsub.f32 %v3430_v56, %v4477_v42  ;;  %v238_v56 = vsel %vm230_vm0, %v184_v62, 0  ;;  %v3694_v42 = vpack.c.bf16 %v469_v43, %v466_v40  ;;  %v3714_v62 = vsub.f32 %v3530_v60, %v409_v48 }
  0x33   : > { %v3682_v26 = vsub.f32 %v3472_v8, %v4478_v53  ;;  %v771_v8 = vsub.f32 %v3569_v46, %v770_v58  ;;  %v4489_v37 = vand.u32 4294901760, %v3536_v33  ;;  %v3730_v60 = vsub.f32 %v316_v10, %v412_v27 }
  0x34   : > { %4481 = vst [vmem:[#allocation21_spill] sm:$0xff] %v3694_v42  ;;  %4487 = vst [vmem:[#allocation25_spill] sm:$0xff] %v3714_v62  ;;  %v777_v49 = vand.u32 4294901760, %v3586_v44  ;;  %v784_v10 = vand.u32 4294901760, %v3597_v11 }
  0x35   : > { %2646 = vmatpush3.bf16.xpose.msra.mxu1 %v3462_v2  ;;  %2742 = vmatpush3.bf16.xpose.msra.mxu0 %v3462_v2  ;;  %v4485_v2 = vand.u32 4294901760, %v3481_v18  ;;  %v772_v48 = vand.u32 4294901760, %v771_v8  ;;  %v659_v8 = vsub.f32 %v3579_v3, %v658_v38 }
  0x36   : > { %2648 = vmatprep.subr.bf16.mxu1 %v3469_v7  ;;  %2744 = vmatprep.subr.bf16.mxu0 %v3469_v7  ;;  %v764_v7 = vsub.f32 %v3558_v36, %v763_v57 }
  0x3d   : > { %2650 = vmatpush3.bf16.xpose.msra.mxu1 %v3515_v63  ;;  %2746 = vmatpush3.bf16.xpose.msra.mxu0 %v3515_v63 }
  0x3e   : > { %2652 = vmatprep.subr.bf16.mxu1 %v3524_v1  ;;  %2748 = vmatprep.subr.bf16.mxu0 %v3524_v1  ;;  %v4476_v1 = vand.u32 4294901760, %v3427_v55 }
  0x40   : > { %v3672_v63 = vsub.f32 %v3427_v55, %v4476_v1  ;;  %v322_v55 = vsel %vm230_vm0, %v212_v39, 0  ;;  %v325_v1 = vsel %vm230_vm0, %v213_v41, 0  ;;  %v3708_v39 = vsub.f32 %v3481_v18, %v4485_v2 }
  0x41   : > { %v3711_v41 = vsub.f32 %v3527_v5, %v406_v47  ;;  %v3727_v2 = vsub.f32 %v3536_v33, %v4489_v37  ;;  %v418_v18 = vand.u32 4294901760, %v322_v55  ;;  %v421_v34 = vand.u32 4294901760, %v325_v1 }
  0x42   : > { %v3733_v47 = vsub.f32 %v319_v6, %v415_v32  ;;  %v765_v5 = vand.u32 4294901760, %v764_v7  ;;  %v3740_v33 = vsub.f32 %v370_v14, %v466_v40  ;;  %v652_v7 = vsub.f32 %v3574_v45, %v651_v51 }
  0x43   : > { %4486 = vst [vmem:[#allocation24_spill] sm:$0xff] %v3711_v41  ;;  %v3754_v14 = vpack.c.bf16 %v421_v34, %v418_v18  ;;  %v3756_v40 = vsub.f32 %v322_v55, %v418_v18  ;;  %v3767_v19 = vsub.f32 %v325_v1, %v421_v34  ;;  %v785_v55 = vsub.f32 %v3597_v11, %v784_v10 }
  0x44   : > { %4490 = vst [vmem:[#allocation27_spill] sm:$0xff] %v3733_v47  ;;  %4492 = vst [vmem:[#allocation29_spill] sm:$0xff] %v3740_v33  ;;  %v660_v18 = vand.u32 4294901760, %v659_v8 }
  0x45   : > { %2654 = vmatpush3.bf16.xpose.msra.mxu1 %v3581_v9  ;;  %2750 = vmatpush3.bf16.xpose.msra.mxu0 %v3581_v9  ;;  %v235_v9 = vsel %vm230_vm0, %v183_v29, 0  ;;  %v3689_v29 = vpack.c.bf16 %v415_v32, %v412_v27  ;;  %v186_v27 = vld [vmem:[%s3435_s27 + $0x20] sm:$0xff]  ;;  %v3747_v32 = vsub.f32 %v3606_v15, %v469_v43  ;;  %4495 = vst [vmem:[#allocation32_spill] sm:$0xff] %v3754_v14  ;;  %4496 = vst [vmem:[#allocation33_spill] sm:$0xff] %v3756_v40 }
  0x46   : > { %2656 = vmatprep.subr.bf16.mxu1 %v3590_v4  ;;  %2752 = vmatprep.subr.bf16.mxu0 %v3590_v4  ;;  %v3666_v4 = vsub.f32 %v3424_v54, %v4475_v35  ;;  %v4479_v54 = vand.u32 4294901760, %v3475_v13  ;;  %v3698_v53 = vand.u32 4294901760, %v235_v9  ;;  %v244_v43 = vsel %vm230_vm0, %v186_v27, 0  ;;  %4498 = vst [vmem:[#allocation35_spill] sm:$0xff] %v3767_v19 }
  0x47   : > { %4480 = vst [vmem:[#allocation20_spill] sm:$0xff] %v3689_v29  ;;  %4493 = vst [vmem:[#allocation30_spill] sm:$0xff] %v3747_v32  ;;  %v2761_v27 = vpack.c.bf16 %v658_v38, %v651_v51  ;;  %v3779_v34 = vand.u32 4294901760, %v244_v43  ;;  %v786_v51 = vand.u32 4294901760, %v785_v55  ;;  %v189_v55 = vld [vmem:[%s3435_s27 + $0x38] sm:$0xff]  ;;  %v812_v40 = vand.u32 4294901760, %v3656_v25 }
  0x48   : > { %v3687_v35 = vsub.f32 %v3475_v13, %v4479_v54  ;;  %4482 = vst [vmem:[#allocation22_spill] sm:$0xff] %v3698_v53  ;;  %v4483_v13 = vand.u32 4294901760, %v3478_v17  ;;  %v3738_v37 = vsub.f32 %v235_v9, %v3698_v53 }
  0x49   : > { %4499 = vst [vmem:[#allocation36_spill] sm:$0xff] %v3779_v34 }
  0x4a   : > { %v3703_v54 = vsub.f32 %v3478_v17, %v4483_v13  ;;  %v3721_v17 = vand.u32 4294901760, %v238_v56  ;;  %v185_v13 = vld [vmem:[%s3435_s27 + $0x18] sm:$0xff]  ;;  %4491 = vst [vmem:[#allocation28_spill] sm:$0xff] %v3738_v37  ;;  %v3761_v53 = vand.u32 4294901760, %v3738_v37 }
  0x4b   : > { %v241_v6 = vsel %vm230_vm0, %v185_v13, 0  ;;  %v2663_v13 = vpack.c.bf16 %v772_v48, %v765_v5  ;;  %v247_v48 = vsel %vm230_vm0, %v187_v28, 0  ;;  %v791_v28 = vand.u32 4294901760, %v3616_v16 }
  0x4c   : > { %4484 = vst [vmem:[#allocation23_spill] sm:$0xff] %v3703_v54  ;;  %4488 = vst [vmem:[#allocation26_spill] sm:$0xff] %v3721_v17  ;;  %v3752_v9 = vsub.f32 %v238_v56, %v3721_v17  ;;  %v3763_v15 = vand.u32 4294901760, %v241_v6  ;;  %v778_v56 = vsub.f32 %v3586_v44, %v777_v49  ;;  %v250_v17 = vsel %vm230_vm0, %v188_v22, 0 }
  0x4d   : > { %2658 = vmatpush3.bf16.xpose.msra.mxu1 %v3689_v29  ;;  %2754 = vmatpush3.bf16.xpose.msra.mxu0 %v3689_v29  ;;  %v665_v29 = vand.u32 4294901760, %v3602_v12  ;;  %v3790_v19 = vand.u32 4294901760, %v247_v48 }
  0x4e   : > { %2660 = vmatprep.subr.bf16.mxu1 %v3694_v42  ;;  %2756 = vmatprep.subr.bf16.mxu0 %v3694_v42  ;;  %4494 = vst [vmem:[#allocation31_spill] sm:$0xff] %v3752_v9  ;;  %v2759_v42 = vpack.c.bf16 %v770_v58, %v763_v57  ;;  %4497 = vst [vmem:[#allocation34_spill] sm:$0xff] %v3763_v15  ;;  %v672_v57 = vand.u32 4294901760, %v3611_v23  ;;  %v653_v58 = vand.u32 4294901760, %v652_v7  ;;  %v3773_v5 = vand.u32 4294901760, %v3752_v9 }
  0x4f   : > { %v666_v1 = vsub.f32 %v3602_v12, %v665_v29  ;;  %v486_v7 = vsub.f32 %v3738_v37, %v3761_v53  ;;  %v3785_v8 = vsub.f32 %v241_v6, %v3763_v15  ;;  %v779_v38 = vand.u32 4294901760, %v778_v56  ;;  %4501 = vst [vmem:[#allocation38_spill] sm:$0xff] %v3790_v19 }
  0x50   : > { %v673_v20 = vsub.f32 %v3611_v23, %v672_v57  ;;  %v2665_v22 = vpack.c.bf16 %v660_v18, %v653_v58  ;;  %v3794_v37 = vand.u32 4294901760, %v250_v17  ;;  %v3797_v15 = vsub.f32 %v244_v43, %v3779_v34  ;;  %v190_v43 = vld [vmem:[%s3435_s27 + $0x40] sm:$0xff] }
  0x51   : > { %4500 = vst [vmem:[#allocation37_spill] sm:$0xff] %v3785_v8  ;;  %v667_v6 = vand.u32 4294901760, %v666_v1  ;;  %v487_v32 = vand.u32 4294901760, %v486_v7  ;;  %v3803_v33 = vand.u32 4294901760, %v3785_v8  ;;  %v792_v58 = vsub.f32 %v3616_v16, %v791_v28 }
  0x52   : > { %4502 = vst [vmem:[#allocation39_spill] sm:$0xff] %v3794_v37  ;;  %4503 = vst [vmem:[#allocation40_spill] sm:$0xff] %v3797_v15  ;;  %v3808_v1 = vsub.f32 %v247_v48, %v3790_v19  ;;  %v3814_v7 = vsub.f32 %v250_v17, %v3794_v37  ;;  %v805_v56 = vand.u32 4294901760, %v3637_v31  ;;  %v253_v34 = vsel %vm230_vm0, %v189_v55, 0 }
  0x53   : > { %v508_v48 = vsub.f32 %v3785_v8, %v3803_v33  ;;  %v191_v8 = vld [vmem:[%s3435_s27 + $0x48] sm:$0xff]  ;;  %v4508_v19 = vand.u32 4294901760, %v3661_v61 }
  0x54   : > { %4504 = vst [vmem:[#allocation41_spill] sm:$0xff] %v3808_v1  ;;  %4505 = vst [vmem:[#allocation42_spill] sm:$0xff] %v3814_v7 }
  0x55   : > { %2662 = vmatpush3.bf16.xpose.msra.mxu1 %v3754_v14  ;;  %2758 = vmatpush3.bf16.xpose.msra.mxu0 %v3754_v14  ;;  %v798_v14 = vand.u32 4294901760, %v3621_v21  ;;  %v3857_v47 = vsub.f32 %v3661_v61, %v4508_v19 }
  0x56   : > { %2664 = vmatprep.subr.bf16.mxu1 %v2663_v13  ;;  %2760 = vmatprep.subr.bf16.mxu0 %v2759_v42  ;;  %v497_v42 = vsub.f32 %v3752_v9, %v3773_v5  ;;  %v2763_v13 = vpack.c.bf16 %v784_v10, %v777_v49  ;;  %v2667_v49 = vpack.c.bf16 %v786_v51, %v779_v38  ;;  %v674_v10 = vand.u32 4294901760, %v673_v20 }
  0x57   : > { %v799_v18 = vsub.f32 %v3621_v21, %v798_v14  ;;  %v2765_v9 = vpack.c.bf16 %v672_v57, %v665_v29  ;;  %v3820_v29 = vand.u32 4294901760, %v3797_v15  ;;  %v4506_v57 = vand.u32 4294901760, %v3626_v24 }
  0x58   : > { %v498_v20 = vand.u32 4294901760, %v497_v42  ;;  %v793_v38 = vand.u32 4294901760, %v792_v58  ;;  %v256_v51 = vsel %vm230_vm0, %v190_v43, 0  ;;  %v3841_v58 = vand.u32 4294901760, %v3814_v7 }
  0x59   : > { %v2767_v43 = vpack.c.bf16 %v798_v14, %v791_v28  ;;  %v509_v42 = vand.u32 4294901760, %v508_v48 }
  0x5c   : > { %2280 = vmatmul.mubr.f32.vlgmr.msra.gmra.mrb[0].mxu1 %v3538_v59  ;;  %2472 = vmatmul.mubr.f32.vlgmr.msra.gmra.mrb[0].mxu0 %v3503_v50  ;;  %v680_v59 = vsub.f32 %v3626_v24, %v4506_v57  ;;  %v4507_v50 = vand.u32 4294901760, %v3632_v30  ;;  %v3837_v57 = vand.u32 4294901760, %v253_v34 }
  0x5d   : > { %2666 = vmatpush3.bf16.xpose.msra.mxu1 %v2665_v22  ;;  %2762 = vmatpush3.bf16.xpose.msra.mxu0 %v2761_v27  ;;  %v800_v27 = vand.u32 4294901760, %v799_v18  ;;  %v3833_v22 = vand.u32 4294901760, %v3808_v1  ;;  %v806_v18 = vsub.f32 %v3637_v31, %v805_v56 }
  0x5e   : > { %v687_v17 = vsub.f32 %v3632_v30, %v4507_v50  ;;  %2281 = vmatprep.mubr.f32.mxu1 %v487_v32  ;;  %2473 = vmatprep.mubr.f32.mxu0 %v3761_v53  ;;  %v2669_v50 = vpack.c.bf16 %v674_v10, %v667_v6  ;;  %v681_v55 = vand.u32 4294901760, %v680_v59  ;;  %v4423_v10 = vand.u32 4294901760, %v3672_v63 }
  0x5f   : > { %2668 = vmatprep.subr.bf16.mxu1 %v2667_v49  ;;  %2764 = vmatprep.subr.bf16.mxu0 %v2763_v13  ;;  %v813_v13 = vsub.f32 %v3656_v25, %v812_v40  ;;  %v519_v49 = vsub.f32 %v3797_v15, %v3820_v29  ;;  %v530_v37 = vsub.f32 %v3808_v1, %v3833_v22  ;;  %v4509_v15 = vand.u32 4294901760, %v3666_v4 }
  0x60   : > { %2282 = vmatmul.mubr.f32.gmra.mrb[2].mxu1 %v487_v32  ;;  %2474 = vmatmul.mubr.f32.gmra.mrb[2].mxu0 %v3761_v53  ;;  %v3848_v32 = vand.u32 4294901760, %v256_v51  ;;  %v2671_v53 = vpack.c.bf16 %v800_v27, %v793_v38  ;;  %v688_v6 = vand.u32 4294901760, %v687_v17  ;;  %v3865_v28 = vsub.f32 %v253_v34, %v3837_v57 }
  0x61   : > { %2283 = vmatprep.mubr.f32.mxu1 %v498_v20  ;;  %2475 = vmatprep.mubr.f32.mxu0 %v3773_v5  ;;  %v3862_v14 = vsub.f32 %v3666_v4, %v4509_v15  ;;  %v541_v59 = vsub.f32 %v3814_v7, %v3841_v58  ;;  %v807_v17 = vand.u32 4294901760, %v806_v18  ;;  %v814_v48 = vand.u32 4294901760, %v813_v13 }
  0x62   : > { %4510 = vst [vmem:[#allocation43_spill] sm:$0xff] %v3865_v28  ;;  %v4422_v38 = vand.u32 4294901760, %v3677_v0  ;;  %v520_v19 = vand.u32 4294901760, %v519_v49  ;;  %v4511_v15 = vand.u32 4294901760, %v3626_v24  ;;  %v4512_v27 = vand.u32 4294901760, %v3632_v30 }
  0x63   : > { %v2673_v18 = vpack.c.bf16 %v688_v6, %v681_v55  ;;  %v2771_v13 = vpack.c.bf16 %v812_v40, %v805_v56  ;;  %v695_v49 = vand.u32 4294901760, %v3857_v47  ;;  %v542_v40 = vand.u32 4294901760, %v541_v59  ;;  %v193_v59 = vld [vmem:[%s3435_s27 + $0x58] sm:$0xff] }
  0x64   : > { %2284 = vmatmul.mubr.f32.gmra.mrb[4].mxu1 %v498_v20  ;;  %2476 = vmatmul.mubr.f32.gmra.mrb[4].mxu0 %v3773_v5  ;;  %v2769_v34 = vpack.c.bf16 %v4512_v27, %v4511_v15  ;;  %v3876_v20 = vsub.f32 %v256_v51, %v3848_v32  ;;  %v259_v5 = vsel %vm230_vm0, %v191_v8, 0  ;;  %v702_v51 = vand.u32 4294901760, %v3862_v14  ;;  %v192_v8 = vld [vmem:[%s3435_s27 + $0x50] sm:$0xff] }
  0x65   : > { %2670 = vmatpush3.bf16.xpose.msra.mxu1 %v2669_v50  ;;  %2766 = vmatpush3.bf16.xpose.msra.mxu0 %v2765_v9  ;;  %v3883_v9 = vsub.f32 %v3672_v63, %v4423_v10  ;;  %v531_v50 = vand.u32 4294901760, %v530_v37  ;;  %v3888_v15 = vand.u32 4294901760, %v3865_v28  ;;  %v2675_v56 = vpack.c.bf16 %v814_v48, %v807_v17  ;;  %v4520_v10 = vld [vmem:[#allocation33_spill] sm:$0xff] }
  0x66   : > { %4513 = vst [vmem:[#allocation44_spill] sm:$0xff] %v3876_v20  ;;  %2285 = vmatprep.mubr.f32.mxu1 %v509_v42  ;;  %2477 = vmatprep.mubr.f32.mxu0 %v3803_v33  ;;  %v827_v55 = vsub.f32 %v3677_v0, %v4422_v38  ;;  %v3899_v47 = vand.u32 4294901760, %v3876_v20  ;;  %v4424_v37 = vand.u32 4294901760, %v3682_v26  ;;  %v262_v6 = vsel %vm230_vm0, %v192_v8, 0  ;;  %v4519_v38 = vld [vmem:[#allocation30_spill] sm:$0xff] }
  0x67   : > { %2672 = vmatprep.subr.bf16.mxu1 %v2671_v53  ;;  %2768 = vmatprep.subr.bf16.mxu0 %v2767_v43  ;;  %v3895_v53 = vand.u32 4294901760, %v259_v5  ;;  %v821_v43 = vand.u32 4294901760, %v3883_v9  ;;  %v552_v17 = vsub.f32 %v3865_v28, %v3888_v15  ;;  %v3928_v27 = vand.u32 4294901760, %v262_v6 }
  0x68   : > { %2286 = vmatmul.mubr.f32.gmra.mrb[6].mxu1 %v509_v42  ;;  %2478 = vmatmul.mubr.f32.gmra.mrb[6].mxu0 %v3803_v33  ;;  %v828_v8 = vand.u32 4294901760, %v827_v55  ;;  %v194_v33 = vld [vmem:[%s3435_s27 + $0x60] sm:$0xff]  ;;  %v4521_v42 = vld [vmem:[#allocation35_spill] sm:$0xff]  ;;  %v2677_v55 = vpack.c.bf16 %v702_v51, %v695_v49  ;;  %v4523_v48 = vand.u32 4294901760, %v3661_v61  ;;  %v4527_v49 = vand.u32 4294901760, %v3672_v63 }
  0x69   : > { %4514 = vst [vmem:[#allocation45_spill] sm:$0xff] %v3895_v53  ;;  %2287 = vmatprep.mubr.f32.mxu1 %v520_v19  ;;  %2479 = vmatprep.mubr.f32.mxu0 %v3820_v29  ;;  %v3921_v14 = vsub.f32 %v259_v5, %v3895_v53  ;;  %4516 = vst [vmem:[#allocation47_spill] sm:$0xff] %v3928_v27  ;;  %v4517_v5 = vld [vmem:[#allocation27_spill] sm:$0xff]  ;;  %v4528_v51 = vand.u32 4294901760, %v3677_v0  ;;  %v4530_v1 = vand.u32 4294901760, %v3708_v39  ;;  %v4533_v53 = vand.u32 4294901760, %v3682_v26 }
  0x6a   : > { %v2679_v28 = vpack.c.bf16 %v828_v8, %v821_v43  ;;  %v721_v43 = vand.u32 4294901760, %v3711_v41  ;;  %v195_v8 = vld [vmem:[%s3435_s27 + $0x68] sm:$0xff] }
  0x6b   : > { %4515 = vst [vmem:[#allocation46_spill] sm:$0xff] %v3921_v14  ;;  %v3966_v9 = vand.u32 4294901760, %v3921_v14  ;;  %v2775_v7 = vpack.c.bf16 %v4528_v51, %v4527_v49 }
  0x6c   : > { %2288 = vmatmul.mubr.f32.gmra.mrb[8].mxu1 %v520_v19  ;;  %2480 = vmatmul.mubr.f32.gmra.mrb[8].mxu0 %v3820_v29  ;;  %v265_v29 = vsel %vm230_vm0, %v193_v59, 0  ;;  %v4518_v19 = vld [vmem:[#allocation29_spill] sm:$0xff] }
  0x6d   : > { %2674 = vmatpush3.bf16.xpose.msra.mxu1 %v2673_v18  ;;  %2770 = vmatpush3.bf16.xpose.msra.mxu0 %v2769_v34  ;;  %v563_v18 = vsub.f32 %v3876_v20, %v3899_v47  ;;  %v3969_v34 = vsub.f32 %v262_v6, %v3928_v27  ;;  %v3971_v20 = vand.u32 4294901760, %v265_v29  ;;  %v841_v6 = vsub.f32 %v3708_v39, %v4530_v1 }
  0x6e   : > { %2289 = vmatprep.mubr.f32.mxu1 %v531_v50  ;;  %2481 = vmatprep.mubr.f32.mxu0 %v3833_v22  ;;  %v574_v49 = vsub.f32 %v3921_v14, %v3966_v9  ;;  %v728_v1 = vand.u32 4294901760, %v3714_v62 }
  0x6f   : > { %2676 = vmatprep.subr.bf16.mxu1 %v2675_v56  ;;  %2772 = vmatprep.subr.bf16.mxu0 %v2771_v13  ;;  %v708_v13 = vsub.f32 %v3682_v26, %v4424_v37  ;;  %v4522_v56 = vand.u32 4294901760, %v3687_v35  ;;  %4525 = vst [vmem:[#allocation27_spill] sm:$0xff] %v3969_v34  ;;  %v553_v37 = vand.u32 4294901760, %v552_v17  ;;  %4526 = vst [vmem:[#allocation29_spill] sm:$0xff] %v3971_v20  ;;  %v564_v17 = vand.u32 4294901760, %v563_v18 }
  0x70   : > { %2290 = vmatmul.mubr.f32.gmra.mrb[10].mxu1 %v531_v50  ;;  %2482 = vmatmul.mubr.f32.gmra.mrb[10].mxu0 %v3833_v22  ;;  %v4524_v50 = vand.u32 4294901760, %v3666_v4  ;;  %v3990_v51 = vand.u32 4294901760, %v3969_v34 }
  0x71   : > { %v715_v59 = vsub.f32 %v3687_v35, %v4522_v56  ;;  %2291 = vmatprep.mubr.f32.mxu1 %v542_v40  ;;  %2483 = vmatprep.mubr.f32.mxu0 %v3841_v58  ;;  %v268_v56 = vsel %vm230_vm0, %v194_v33, 0  ;;  %v709_v27 = vand.u32 4294901760, %v708_v13  ;;  %v842_v13 = vand.u32 4294901760, %v841_v6 }
  0x72   : > { %v2773_v22 = vpack.c.bf16 %v4524_v50, %v4523_v48  ;;  %v4529_v48 = vand.u32 4294901760, %v3703_v54 }
  0x73   : > { %v716_v33 = vand.u32 4294901760, %v715_v59  ;;  %v854_v59 = vand.u32 4294901760, %v3727_v2 }
  0x74   : > { %v834_v50 = vsub.f32 %v3703_v54, %v4529_v48  ;;  %2292 = vmatmul.mubr.f32.gmra.mrb[12].mxu1 %v542_v40  ;;  %2484 = vmatmul.mubr.f32.gmra.mrb[12].mxu0 %v3841_v58  ;;  %v3993_v40 = vand.u32 4294901760, %v268_v56  ;;  %v3997_v58 = vsub.f32 %v265_v29, %v3971_v20  ;;  %v196_v48 = vld [vmem:[%s3435_s27 + $0x70] sm:$0xff]  ;;  %v4534_v29 = vand.u32 4294901760, %v3687_v35 }
  0x75   : > { %2678 = vmatpush3.bf16.xpose.msra.mxu1 %v2677_v55  ;;  %2774 = vmatpush3.bf16.xpose.msra.mxu0 %v2773_v22  ;;  %v271_v22 = vsel %vm230_vm0, %v195_v8, 0  ;;  %v2681_v14 = vpack.c.bf16 %v716_v33, %v709_v27  ;;  %v722_v55 = vsub.f32 %v3711_v41, %v721_v43  ;;  %v274_v33 = vsel %vm230_vm0, %v196_v48, 0 }
  0x76   : > { %4531 = vst [vmem:[#allocation30_spill] sm:$0xff] %v3993_v40  ;;  %2293 = vmatprep.mubr.f32.mxu1 %v553_v37  ;;  %2485 = vmatprep.mubr.f32.mxu0 %v3888_v15  ;;  %4532 = vst [vmem:[#allocation33_spill] sm:$0xff] %v3997_v58  ;;  %v835_v18 = vand.u32 4294901760, %v834_v50  ;;  %v2777_v20 = vpack.c.bf16 %v4534_v29, %v4533_v53  ;;  %v4017_v27 = vand.u32 4294901760, %v3997_v58  ;;  %v4536_v53 = vand.u32 4294901760, %v3717_v52 }
  0x77   : > { %2680 = vmatprep.subr.bf16.mxu1 %v2679_v28  ;;  %2776 = vmatprep.subr.bf16.mxu0 %v2775_v7  ;;  %v575_v7 = vand.u32 4294901760, %v574_v49  ;;  %v585_v28 = vsub.f32 %v3969_v34, %v3990_v51  ;;  %v4022_v6 = vand.u32 4294901760, %v271_v22  ;;  %v4538_v49 = vand.u32 4294901760, %v3703_v54 }
  0x78   : > { %2294 = vmatmul.mubr.f32.gmra.mrb[14].mxu1 %v553_v37  ;;  %2486 = vmatmul.mubr.f32.gmra.mrb[14].mxu0 %v3888_v15  ;;  %v729_v37 = vsub.f32 %v3714_v62, %v728_v1  ;;  %v4014_v15 = vsub.f32 %v268_v56, %v3993_v40  ;;  %v848_v50 = vsub.f32 %v3717_v52, %v4536_v53  ;;  %v4539_v29 = vand.u32 4294901760, %v3708_v39  ;;  %v197_v62 = vld [vmem:[%s3435_s27 + $0x78] sm:$0xff]  ;;  %s165_s27 = sand.u32 1, %s3166_s10  }
  0x79   : > { %2295 = vmatprep.mubr.f32.mxu1 %v564_v17  ;;  %2487 = vmatprep.mubr.f32.mxu0 %v3899_v47  ;;  %4537 = vst [vmem:[#allocation48_spill] sm:$0xff] %v4022_v6  ;;  %v2683_v8 = vpack.c.bf16 %v842_v13, %v835_v18  ;;  %v855_v56 = vsub.f32 %v3727_v2, %v854_v59  ;;  %v723_v40 = vand.u32 4294901760, %v722_v55  ;;  %v735_v41 = vand.u32 4294901760, %v3730_v60  ;;  %s2236_s18 = sshll.u32 %s165_s27, 8  ;;  %s4316_s12 = scalar_lea.sflag [#allocation3], %s165_s27 }
  0x7a   : > { %4535 = vst [vmem:[#allocation35_spill] sm:$0xff] %v4014_v15  ;;  %v2779_v34 = vpack.c.bf16 %v4539_v29, %v4538_v49  ;;  %v742_v53 = vand.u32 4294901760, %v4517_v5  ;;  %v586_v48 = vand.u32 4294901760, %v585_v28  ;;  %v730_v18 = vand.u32 4294901760, %v729_v37  ;;  %s4271_s20 = scalar_lea.vmem [#allocation2], %s2236_s18 }
  0x7b   : > { %v606_v13 = vand.u32 4294901760, %v4014_v15  ;;  %v4035_v54 = vand.u32 4294901760, %v274_v33  ;;  %v4041_v55 = vsub.f32 %v271_v22, %v4022_v6  ;;  %v868_v28 = vand.u32 4294901760, %v4519_v38  ;;  %s2142_s24 = sshll.u32 %s4271_s20, 4  ;;  %s4310_s24 = int_to_ptr.vmem [resolvable:$true] %s2142_s24 }
  0x7c   : > { %2296 = vmatmul.mubr.f32.gmra.mrb[16].mxu1 %v564_v17  ;;  %2488 = vmatmul.mubr.f32.gmra.mrb[16].mxu0 %v3899_v47  ;;  %v596_v47 = vsub.f32 %v3997_v58, %v4017_v27  ;;  %v849_v17 = vand.u32 4294901760, %v848_v50  ;;  %v277_v37 = vsel %vm230_vm0, %v197_v62, 0  ;;  %v2781_v49 = vpack.c.bf16 %v728_v1, %v721_v43  ;;  %s3104_s29 = scalar_lea.vmem %s4310_s24, 4096  ;;  %p3111_p1 = scmp.lt.s32.totalorder %s4310_s24, %s3109_s3 }
  0x7d   : > { %2682 = vmatpush3.bf16.xpose.msra.mxu1 %v2681_v14  ;;  %2778 = vmatpush3.bf16.xpose.msra.mxu0 %v2777_v20  ;;  %v856_v14 = vand.u32 4294901760, %v855_v56  ;;  %v861_v20 = vand.u32 4294901760, %v4518_v19  ;;  %v736_v29 = vsub.f32 %v3730_v60, %v735_v41  ;;  %v743_v50 = vsub.f32 %v4517_v5, %v742_v53  ;;  %p3105_p12 = scmp.ne.s32.totalorder %s4310_s24, %s3104_s29  ;;  %p3112_p2 = scmp.lt.s32.totalorder %s3110_s4, %s3104_s29 }
  0x7e   : > { %2297 = vmatprep.mubr.f32.mxu1 %v575_v7  ;;  %2489 = vmatprep.mubr.f32.mxu0 %v3966_v9  ;;  %v2685_v22 = vpack.c.bf16 %v730_v18, %v723_v40  ;;  %v597_v56 = vand.u32 4294901760, %v596_v47  ;;  %v617_v62 = vand.u32 4294901760, %v4041_v55  ;;  %v4540_v43 = vand.u32 4294901760, %v3717_v52 }
  0x7f   : > { %2684 = vmatprep.subr.bf16.mxu1 %v2683_v8  ;;  %2780 = vmatprep.subr.bf16.mxu0 %v2779_v34  ;;  %v607_v34 = vsub.f32 %v4014_v15, %v606_v13  ;;  %v4052_v8 = vsub.f32 %v274_v33, %v4035_v54  ;;  %v862_v58 = vsub.f32 %v4518_v19, %v861_v20  ;;  %v737_v40 = vand.u32 4294901760, %v736_v29  ;;  %p3106_p13 = pnand %p3105_p12, %p3242_p4  ;;  %p3113_p3 = por %p3112_p2, %p3111_p1 }
  0x80   : > { %2298 = vmatmul.mubr.f32.gmra.mrb[18].mxu1 %v575_v7  ;;  %2490 = vmatmul.mubr.f32.gmra.mrb[18].mxu0 %v3966_v9  ;;  %v4055_v7 = vand.u32 4294901760, %v277_v37  ;;  %v2687_v9 = vpack.c.bf16 %v856_v14, %v849_v17  ;;  %v2783_v1 = vpack.c.bf16 %v854_v59, %v4540_v43  ;;  %v869_v6 = vsub.f32 %v4519_v38, %v868_v28 }
  0x81   : > { %2299 = vmatprep.mubr.f32.mxu1 %v586_v48  ;;  %2491 = vmatprep.mubr.f32.mxu0 %v3990_v51  ;;  %v744_v18 = vand.u32 4294901760, %v743_v50  ;;  %v608_v33 = vand.u32 4294901760, %v607_v34  ;;  %v628_v47 = vand.u32 4294901760, %v4052_v8  ;;  %v749_v15 = vand.u32 4294901760, %v4520_v10  ;;  %p3107_p0 = pneg %p3106_p13 }
  0x82   : > { %v756_v17 = vand.u32 4294901760, %v4521_v42  ;;  %v618_v59 = vsub.f32 %v4041_v55, %v617_v62  ;;  %v870_v14 = vand.u32 4294901760, %v869_v6  ;;  %v2785_v29 = vpack.c.bf16 %v742_v53, %v735_v41 }
  0x83   : > { %v629_v50 = vsub.f32 %v4052_v8, %v628_v47  ;;  %p3114_p5 = pnand %p3113_p3, %p3107_p0 }
  0x84   : > { %2300 = vmatmul.mubr.f32.gmra.mrb[20].mxu1 %v586_v48  ;;  %2492 = vmatmul.mubr.f32.gmra.mrb[20].mxu0 %v3990_v51  ;;  %v4068_v48 = vsub.f32 %v277_v37, %v4055_v7  ;;  %v863_v51 = vand.u32 4294901760, %v862_v58  ;;  %v757_v34 = vsub.f32 %v4521_v42, %v756_v17  ;;  %v619_v43 = vand.u32 4294901760, %v618_v59  ;;  %v4560_v59 = vld [vmem:[#allocation11_spill] sm:$0xff] }
  0x85   : > { %2686 = vmatpush3.bf16.xpose.msra.mxu1 %v2685_v22  ;;  %2782 = vmatpush3.bf16.xpose.msra.mxu0 %v2781_v49  ;;  %v2689_v49 = vpack.c.bf16 %v744_v18, %v737_v40  ;;  %v750_v22 = vsub.f32 %v4520_v10, %v749_v15  ;;  %v630_v58 = vand.u32 4294901760, %v629_v50  ;;  %v4545_v40 = vld [vmem:[#allocation6_spill] sm:$0xff]  ;;  %v4548_v18 = vld [vmem:[#allocation7_spill] sm:$0xff] }
  0x86   : > { %2301 = vmatprep.mubr.f32.mxu1 %v597_v56  ;;  %2493 = vmatprep.mubr.f32.mxu0 %v4017_v27  ;;  %v639_v37 = vand.u32 4294901760, %v4068_v48  ;;  %v758_v41 = vand.u32 4294901760, %v757_v34  ;;  %v4578_v34 = vpack.c.bf16 %v3727_v2, %v3717_v52  ;;  %v4582_v52 = vld [vmem:[#allocation20_spill] sm:$0xff] }
  0x87   : > { %2688 = vmatprep.subr.bf16.mxu1 %v2687_v9  ;;  %2784 = vmatprep.subr.bf16.mxu0 %v2783_v1  ;;  %v2691_v9 = vpack.c.bf16 %v870_v14, %v863_v51  ;;  %v2787_v1 = vpack.c.bf16 %v868_v28, %v861_v20  ;;  %v4542_v28 = vld [vmem:[#allocation5_spill] sm:$0xff]  ;;  %v4561_v51 = vld [vmem:[#allocation39_spill] sm:$0xff]  ;;  %v4583_v2 = vld [vmem:[#allocation48_spill] sm:$0xff] }
  0x88   : > { %2302 = vmatmul.mubr.f32.gmra.mrb[22].mxu1 %v597_v56  ;;  %2494 = vmatmul.mubr.f32.gmra.mrb[22].mxu0 %v4017_v27  ;;  %v751_v27 = vand.u32 4294901760, %v750_v22  ;;  %v640_v6 = vsub.f32 %v4068_v48, %v639_v37  ;;  %v2789_v56 = vpack.c.bf16 %v756_v17, %v749_v15  ;;  %v4544_v15 = vpack.c.bf16 %v3579_v3, %v3574_v45  ;;  %v4552_v3 = vld [vmem:[#allocation34_spill] sm:$0xff]  ;;  %v4555_v17 = vld [vmem:[#allocation36_spill] sm:$0xff]  ;;  %v4577_v22 = vld [vmem:[#allocation29_spill] sm:$0xff] }
  0x89   : > { %2303 = vmatprep.mubr.f32.mxu1 %v608_v33  ;;  %2495 = vmatprep.mubr.f32.mxu0 %v606_v13  ;;  %v4550_v45 = vpack.c.bf16 %v3611_v23, %v3602_v12  ;;  %v4556_v12 = vpack.c.bf16 %v3632_v30, %v3626_v24  ;;  %v4557_v23 = vld [vmem:[#allocation10_spill] sm:$0xff]  ;;  %v4562_v24 = vpack.c.bf16 %v3666_v4, %v3661_v61  ;;  %v4563_v30 = vld [vmem:[#allocation12_spill] sm:$0xff]  ;;  %v4568_v4 = vld [vmem:[#allocation45_spill] sm:$0xff] }
  0x8a   : > { %v2693_v53 = vpack.c.bf16 %v758_v41, %v751_v27  ;;  %v641_v20 = vand.u32 4294901760, %v640_v6  ;;  %v4566_v61 = vpack.c.bf16 %v3687_v35, %v3682_v26  ;;  %v4573_v26 = vld [vmem:[#allocation25_spill] sm:$0xff]  ;;  %v4574_v35 = vld [vmem:[#allocation24_spill] sm:$0xff]  ;;  %v4594_v6 = vld [vmem:[#allocation42_spill] sm:$0xff] }
  0x8b   : > { %v4575_v50 = vpack.c.bf16 %v4573_v26, %v4574_v35  ;;  %v4592_v27 = vld [vmem:[#allocation40_spill] sm:$0xff]  ;;  %v4593_v41 = vld [vmem:[#allocation41_spill] sm:$0xff] }
  0x8c   : > { %2304 = vmatmul.mubr.f32.gmra.mrb[24].mxu1 %v608_v33  ;;  %2496 = vmatmul.mubr.f32.gmra.mrb[24].mxu0 %v606_v13  ;;  %v4541_v13 = vpack.c.bf16 %v3569_v46, %v3558_v36  ;;  %v4546_v46 = vld [vmem:[#allocation22_spill] sm:$0xff]  ;;  %v4547_v36 = vpack.c.bf16 %v3597_v11, %v3586_v44  ;;  %v4551_v44 = vld [vmem:[#allocation8_spill] sm:$0xff]  ;;  %v4553_v11 = vpack.c.bf16 %v3621_v21, %v3616_v16 }
  0x8d   : > { %2690 = vmatpush3.bf16.xpose.msra.mxu1 %v2689_v49  ;;  %2786 = vmatpush3.bf16.xpose.msra.mxu0 %v2785_v29  ;;  %v4549_v33 = vld [vmem:[#allocation26_spill] sm:$0xff]  ;;  %v4559_v21 = vpack.c.bf16 %v3656_v25, %v3637_v31  ;;  %v4564_v31 = vpack.c.bf16 %v3677_v0, %v3672_v63  ;;  %v4565_v25 = vld [vmem:[#allocation13_spill] sm:$0xff]  ;;  %v4567_v63 = vld [vmem:[#allocation16_spill] sm:$0xff] }
  0x8e   : > { %2305 = vmatprep.mubr.f32.mxu1 %v619_v43  ;;  %2497 = vmatprep.mubr.f32.mxu0 %v617_v62  ;;  %v4558_v16 = vld [vmem:[#allocation38_spill] sm:$0xff]  ;;  %v4569_v0 = vld [vmem:[#allocation23_spill] sm:$0xff]  ;;  %v4571_v49 = vld [vmem:[#allocation17_spill] sm:$0xff] }
  0x8f   : > { %2692 = vmatprep.subr.bf16.mxu1 %v2691_v9  ;;  %2788 = vmatprep.subr.bf16.mxu0 %v2787_v1  ;;  %v4570_v14 = vpack.c.bf16 %v3708_v39, %v4569_v0  ;;  %v4572_v29 = vld [vmem:[#allocation47_spill] sm:$0xff]  ;;  %v4576_v39 = vld [vmem:[#allocation18_spill] sm:$0xff]  ;;  %v4581_v9 = vpack.c.bf16 %v4517_v5, %v3730_v60  ;;  %v4584_v1 = vpack.c.bf16 %v4519_v38, %v4518_v19  ;;  %v4587_v38 = vld [vmem:[#allocation32_spill] sm:$0xff] }
  0x90   : > { %2306 = vmatmul.mubr.f32.gmra.mrb[26].mxu1 %v619_v43  ;;  %2498 = vmatmul.mubr.f32.gmra.mrb[26].mxu0 %v617_v62  ;;  %v4543_v62 = vld [vmem:[#allocation14_spill] sm:$0xff]  ;;  %v4579_v43 = vld [vmem:[#allocation19_spill] sm:$0xff]  ;;  %v4586_v60 = vpack.c.bf16 %v4521_v42, %v4520_v10  ;;  %v4589_v10 = vld [vmem:[#allocation28_spill] sm:$0xff] }
  0x91   : > { %2307 = vmatprep.mubr.f32.mxu1 %v630_v58  ;;  %2499 = vmatprep.mubr.f32.mxu0 %v628_v47  ;;  %v4588_v19 = vld [vmem:[#allocation15_spill] sm:$0xff]  ;;  %v4591_v5 = vld [vmem:[#allocation37_spill] sm:$0xff] }
  0x92   : > { %v4590_v42 = vld [vmem:[#allocation31_spill] sm:$0xff] }
  0x94   : > { %2308 = vmatmul.mubr.f32.gmra.mrb[28].mxu1 %v630_v58  ;;  %2500 = vmatmul.mubr.f32.gmra.mrb[28].mxu0 %v628_v47  ;;  %v4554_v47 = vld [vmem:[#allocation9_spill] sm:$0xff] }
  0x95   : > { %2694 = vmatpush3.bf16.xpose.msra.mxu1 %v2693_v53  ;;  %2790 = vmatpush3.bf16.xpose.msra.mxu0 %v2789_v56  ;;  %v4585_v58 = vld [vmem:[#allocation21_spill] sm:$0xff]  ;;  %v4595_v53 = vld [vmem:[#allocation43_spill] sm:$0xff]  ;;  %v4596_v56 = vld [vmem:[#allocation44_spill] sm:$0xff] }
  0x96   : > { %2309 = vmatprep.mubr.f32.mxu1 %v641_v20  ;;  %2501 = vmatprep.mubr.f32.mxu0 %v639_v37 }
  0x97   : > { %2696 = vmatprep.subr.bf16.mxu1 %v4541_v13  ;;  %2792 = vmatprep.subr.bf16.mxu0 %v4542_v28  ;;  %v4598_v13 = vld [vmem:[#allocation27_spill] sm:$0xff] }
  0x98   : > { %2310 = vmatmul.mubr.f32.gmra.mrb[30].mxu1 %v641_v20  ;;  %2502 = vmatmul.mubr.f32.gmra.mrb[30].mxu0 %v639_v37  ;;  %v4580_v37 = vld [vmem:[#allocation30_spill] sm:$0xff] }
  0x99   : > { %2343 = vmatprep.mubr.f32.mxu1 %v4543_v62  ;;  %2535 = vmatprep.mubr.f32.mxu0 %v4543_v62  ;;  %v4597_v20 = vld [vmem:[#allocation46_spill] sm:$0xff] }
  0x9c   : > { %2344 = vmatmul.mubr.f32.vlgmr.msra.gmra.mrb[0].mxu1 %v4543_v62  ;;  %2536 = vmatmul.mubr.f32.vlgmr.msra.gmra.mrb[0].mxu0 %v4543_v62 }
  0x9d   : > { %2698 = vmatpush3.bf16.xpose.msra.mxu1 %v4544_v15  ;;  %2794 = vmatpush3.bf16.xpose.msra.mxu0 %v4545_v40 }
  0x9e   : > { %2345 = vmatprep.mubr.f32.mxu1 %v4546_v46  ;;  %2537 = vmatprep.mubr.f32.mxu0 %v4546_v46 }
  0x9f   : > { %2700 = vmatprep.subr.bf16.mxu1 %v4547_v36  ;;  %2796 = vmatprep.subr.bf16.mxu0 %v4548_v18 }
  0xa0   : > { %2346 = vmatmul.mubr.f32.gmra.mrb[2].mxu1 %v4546_v46  ;;  %2538 = vmatmul.mubr.f32.gmra.mrb[2].mxu0 %v4546_v46 }
  0xa1   : > { %2347 = vmatprep.mubr.f32.mxu1 %v4549_v33  ;;  %2539 = vmatprep.mubr.f32.mxu0 %v4549_v33 }
  0xa4   : > { %2348 = vmatmul.mubr.f32.gmra.mrb[4].mxu1 %v4549_v33  ;;  %2540 = vmatmul.mubr.f32.gmra.mrb[4].mxu0 %v4549_v33 }
  0xa5   : > { %2702 = vmatpush3.bf16.xpose.msra.mxu1 %v4550_v45  ;;  %2798 = vmatpush3.bf16.xpose.msra.mxu0 %v4551_v44 }
  0xa6   : > { %2349 = vmatprep.mubr.f32.mxu1 %v4552_v3  ;;  %2541 = vmatprep.mubr.f32.mxu0 %v4552_v3 }
  0xa7   : > { %2704 = vmatprep.subr.bf16.mxu1 %v4553_v11  ;;  %2800 = vmatprep.subr.bf16.mxu0 %v4554_v47 }
  0xa8   : > { %2350 = vmatmul.mubr.f32.gmra.mrb[6].mxu1 %v4552_v3  ;;  %2542 = vmatmul.mubr.f32.gmra.mrb[6].mxu0 %v4552_v3 }
  0xa9   : > { %2351 = vmatprep.mubr.f32.mxu1 %v4555_v17  ;;  %2543 = vmatprep.mubr.f32.mxu0 %v4555_v17 }
  0xac   : > { %2352 = vmatmul.mubr.f32.gmra.mrb[8].mxu1 %v4555_v17  ;;  %2544 = vmatmul.mubr.f32.gmra.mrb[8].mxu0 %v4555_v17 }
  0xad   : > { %2706 = vmatpush3.bf16.xpose.msra.mxu1 %v4556_v12  ;;  %2802 = vmatpush3.bf16.xpose.msra.mxu0 %v4557_v23 }
  0xae   : > { %2353 = vmatprep.mubr.f32.mxu1 %v4558_v16  ;;  %2545 = vmatprep.mubr.f32.mxu0 %v4558_v16 }
  0xaf   : > { %2708 = vmatprep.subr.bf16.mxu1 %v4559_v21  ;;  %2804 = vmatprep.subr.bf16.mxu0 %v4560_v59 }
  0xb0   : > { %2354 = vmatmul.mubr.f32.gmra.mrb[10].mxu1 %v4558_v16  ;;  %2546 = vmatmul.mubr.f32.gmra.mrb[10].mxu0 %v4558_v16 }
  0xb1   : > { %2355 = vmatprep.mubr.f32.mxu1 %v4561_v51  ;;  %2547 = vmatprep.mubr.f32.mxu0 %v4561_v51 }
  0xb4   : > { %2356 = vmatmul.mubr.f32.gmra.mrb[12].mxu1 %v4561_v51  ;;  %2548 = vmatmul.mubr.f32.gmra.mrb[12].mxu0 %v4561_v51 }
  0xb5   : > { %2710 = vmatpush3.bf16.xpose.msra.mxu1 %v4562_v24  ;;  %2806 = vmatpush3.bf16.xpose.msra.mxu0 %v4563_v30 }
  0xb6   : > { %2357 = vmatprep.mubr.f32.mxu1 %v3837_v57  ;;  %2549 = vmatprep.mubr.f32.mxu0 %v3837_v57 }
  0xb7   : > { %2712 = vmatprep.subr.bf16.mxu1 %v4564_v31  ;;  %2808 = vmatprep.subr.bf16.mxu0 %v4565_v25 }
  0xb8   : > { %2358 = vmatmul.mubr.f32.gmra.mrb[14].mxu1 %v3837_v57  ;;  %2550 = vmatmul.mubr.f32.gmra.mrb[14].mxu0 %v3837_v57 }
  0xb9   : > { %2359 = vmatprep.mubr.f32.mxu1 %v3848_v32  ;;  %2551 = vmatprep.mubr.f32.mxu0 %v3848_v32 }
  0xbc   : > { %2360 = vmatmul.mubr.f32.gmra.mrb[16].mxu1 %v3848_v32  ;;  %2552 = vmatmul.mubr.f32.gmra.mrb[16].mxu0 %v3848_v32 }
  0xbd   : > { %2714 = vmatpush3.bf16.xpose.msra.mxu1 %v4566_v61  ;;  %2810 = vmatpush3.bf16.xpose.msra.mxu0 %v4567_v63 }
  0xbe   : > { %2361 = vmatprep.mubr.f32.mxu1 %v4568_v4  ;;  %2553 = vmatprep.mubr.f32.mxu0 %v4568_v4 }
  0xbf   : > { %2716 = vmatprep.subr.bf16.mxu1 %v4570_v14  ;;  %2812 = vmatprep.subr.bf16.mxu0 %v4571_v49 }
  0xc0   : > { %2362 = vmatmul.mubr.f32.gmra.mrb[18].mxu1 %v4568_v4  ;;  %2554 = vmatmul.mubr.f32.gmra.mrb[18].mxu0 %v4568_v4 }
  0xc1   : > { %2363 = vmatprep.mubr.f32.mxu1 %v4572_v29  ;;  %2555 = vmatprep.mubr.f32.mxu0 %v4572_v29 }
  0xc4   : > { %2364 = vmatmul.mubr.f32.gmra.mrb[20].mxu1 %v4572_v29  ;;  %2556 = vmatmul.mubr.f32.gmra.mrb[20].mxu0 %v4572_v29 }
  0xc5   : > { %2718 = vmatpush3.bf16.xpose.msra.mxu1 %v4575_v50  ;;  %2814 = vmatpush3.bf16.xpose.msra.mxu0 %v4576_v39 }
  0xc6   : > { %2365 = vmatprep.mubr.f32.mxu1 %v4577_v22  ;;  %2557 = vmatprep.mubr.f32.mxu0 %v4577_v22 }
  0xc7   : > { %2720 = vmatprep.subr.bf16.mxu1 %v4578_v34  ;;  %2816 = vmatprep.subr.bf16.mxu0 %v4579_v43 }
  0xc8   : > { %2366 = vmatmul.mubr.f32.gmra.mrb[22].mxu1 %v4577_v22  ;;  %2558 = vmatmul.mubr.f32.gmra.mrb[22].mxu0 %v4577_v22 }
  0xc9   : > { %2367 = vmatprep.mubr.f32.mxu1 %v4580_v37  ;;  %2559 = vmatprep.mubr.f32.mxu0 %v4580_v37 }
  0xcc   : > { %2368 = vmatmul.mubr.f32.gmra.mrb[24].mxu1 %v4580_v37  ;;  %2560 = vmatmul.mubr.f32.gmra.mrb[24].mxu0 %v4580_v37 }
  0xcd   : > { %2722 = vmatpush3.bf16.xpose.msra.mxu1 %v4581_v9  ;;  %2818 = vmatpush3.bf16.xpose.msra.mxu0 %v4582_v52 }
  0xce   : > { %2369 = vmatprep.mubr.f32.mxu1 %v4583_v2  ;;  %2561 = vmatprep.mubr.f32.mxu0 %v4583_v2 }
  0xcf   : > { %2724 = vmatprep.subr.bf16.mxu1 %v4584_v1  ;;  %2820 = vmatprep.subr.bf16.mxu0 %v4585_v58 }
  0xd0   : > { %2370 = vmatmul.mubr.f32.gmra.mrb[26].mxu1 %v4583_v2  ;;  %2562 = vmatmul.mubr.f32.gmra.mrb[26].mxu0 %v4583_v2 }
  0xd1   : > { %2371 = vmatprep.mubr.f32.mxu1 %v4035_v54  ;;  %2563 = vmatprep.mubr.f32.mxu0 %v4035_v54 }
  0xd4   : > { %2372 = vmatmul.mubr.f32.gmra.mrb[28].mxu1 %v4035_v54  ;;  %2564 = vmatmul.mubr.f32.gmra.mrb[28].mxu0 %v4035_v54 }
  0xd5   : > { %2726 = vmatpush3.bf16.xpose.msra.mxu1 %v4586_v60  ;;  %2822 = vmatpush3.bf16.xpose.msra.mxu0 %v4587_v38 }
  0xd6   : > { %2373 = vmatprep.mubr.f32.mxu1 %v4055_v7  ;;  %2565 = vmatprep.mubr.f32.mxu0 %v4055_v7 }
  0xd8   : > { %2374 = vmatmul.mubr.f32.gmra.mrb[30].mxu1 %v4055_v7  ;;  %2566 = vmatmul.mubr.f32.gmra.mrb[30].mxu0 %v4055_v7 }
  0xd9   : > { %2407 = vmatprep.mubr.f32.mxu1 %v4588_v19  ;;  %2599 = vmatprep.mubr.f32.mxu0 %v4543_v62 }
  0xdc   : > { %2408 = vmatmul.mubr.f32.vlgmr.msra.gmra.mrb[0].mxu1 %v4588_v19  ;;  %2600 = vmatmul.mubr.f32.vlgmr.msra.gmra.mrb[0].mxu0 %v4543_v62 }
  0xdd   : > { %2409 = vmatprep.mubr.f32.mxu1 %v4589_v10  ;;  %2601 = vmatprep.mubr.f32.mxu0 %v4546_v46 }
  0xe0   : > { %2410 = vmatmul.mubr.f32.gmra.mrb[2].mxu1 %v4589_v10  ;;  %2602 = vmatmul.mubr.f32.gmra.mrb[2].mxu0 %v4546_v46 }
  0xe1   : > { %2411 = vmatprep.mubr.f32.mxu1 %v4590_v42  ;;  %2603 = vmatprep.mubr.f32.mxu0 %v4549_v33 }
  0xe4   : > { %2412 = vmatmul.mubr.f32.gmra.mrb[4].mxu1 %v4590_v42  ;;  %2604 = vmatmul.mubr.f32.gmra.mrb[4].mxu0 %v4549_v33 }
  0xe5   : > { %2413 = vmatprep.mubr.f32.mxu1 %v4591_v5  ;;  %2605 = vmatprep.mubr.f32.mxu0 %v4552_v3 }
  0xe8   : > { %2414 = vmatmul.mubr.f32.gmra.mrb[6].mxu1 %v4591_v5  ;;  %2606 = vmatmul.mubr.f32.gmra.mrb[6].mxu0 %v4552_v3 }
  0xe9   : > { %2415 = vmatprep.mubr.f32.mxu1 %v4592_v27  ;;  %2607 = vmatprep.mubr.f32.mxu0 %v4555_v17 }
  0xec   : > { %2416 = vmatmul.mubr.f32.gmra.mrb[8].mxu1 %v4592_v27  ;;  %2608 = vmatmul.mubr.f32.gmra.mrb[8].mxu0 %v4555_v17 }
  0xed   : > { %2417 = vmatprep.mubr.f32.mxu1 %v4593_v41  ;;  %2609 = vmatprep.mubr.f32.mxu0 %v4558_v16 }
  0xf0   : > { %2418 = vmatmul.mubr.f32.gmra.mrb[10].mxu1 %v4593_v41  ;;  %2610 = vmatmul.mubr.f32.gmra.mrb[10].mxu0 %v4558_v16 }
  0xf1   : > { %2419 = vmatprep.mubr.f32.mxu1 %v4594_v6  ;;  %2611 = vmatprep.mubr.f32.mxu0 %v4561_v51 }
  0xf4   : > { %2420 = vmatmul.mubr.f32.gmra.mrb[12].mxu1 %v4594_v6  ;;  %2612 = vmatmul.mubr.f32.gmra.mrb[12].mxu0 %v4561_v51 }
  0xf5   : > { %2421 = vmatprep.mubr.f32.mxu1 %v4595_v53  ;;  %2613 = vmatprep.mubr.f32.mxu0 %v3837_v57 }
  0xf8   : > { %2422 = vmatmul.mubr.f32.gmra.mrb[14].mxu1 %v4595_v53  ;;  %2614 = vmatmul.mubr.f32.gmra.mrb[14].mxu0 %v3837_v57  ;;  %v4599_v57 = vld [vmem:[#allocation33_spill] sm:$0xff] }
  0xf9   : > { %2423 = vmatprep.mubr.f32.mxu1 %v4596_v56  ;;  %2615 = vmatprep.mubr.f32.mxu0 %v3848_v32 }
  0xfc   : > { %2424 = vmatmul.mubr.f32.gmra.mrb[16].mxu1 %v4596_v56  ;;  %2616 = vmatmul.mubr.f32.gmra.mrb[16].mxu0 %v3848_v32  ;;  %v4600_v32 = vld [vmem:[#allocation35_spill] sm:$0xff] }
  0xfd   : > { %2425 = vmatprep.mubr.f32.mxu1 %v4597_v20  ;;  %2617 = vmatprep.mubr.f32.mxu0 %v4568_v4 }
 0x100   : > { %2426 = vmatmul.mubr.f32.gmra.mrb[18].mxu1 %v4597_v20  ;;  %2618 = vmatmul.mubr.f32.gmra.mrb[18].mxu0 %v4568_v4 }
 0x101   : > { %2427 = vmatprep.mubr.f32.mxu1 %v4598_v13  ;;  %2619 = vmatprep.mubr.f32.mxu0 %v4572_v29 }
 0x104   : > { %2428 = vmatmul.mubr.f32.gmra.mrb[20].mxu1 %v4598_v13  ;;  %2620 = vmatmul.mubr.f32.gmra.mrb[20].mxu0 %v4572_v29 }
 0x105   : > { %2429 = vmatprep.mubr.f32.mxu1 %v4599_v57  ;;  %2621 = vmatprep.mubr.f32.mxu0 %v4577_v22 }
 0x108   : > { %2430 = vmatmul.mubr.f32.gmra.mrb[22].mxu1 %v4599_v57  ;;  %2622 = vmatmul.mubr.f32.gmra.mrb[22].mxu0 %v4577_v22 }
 0x109   : > { %2431 = vmatprep.mubr.f32.mxu1 %v4600_v32  ;;  %2623 = vmatprep.mubr.f32.mxu0 %v4580_v37 }
 0x10c   : > { %2432 = vmatmul.mubr.f32.gmra.mrb[24].mxu1 %v4600_v32  ;;  %2624 = vmatmul.mubr.f32.gmra.mrb[24].mxu0 %v4580_v37 }
 0x10d   : > { %2433 = vmatprep.mubr.f32.mxu1 %v4041_v55  ;;  %2625 = vmatprep.mubr.f32.mxu0 %v4583_v2 }
 0x110   : > { %2434 = vmatmul.mubr.f32.gmra.mrb[26].mxu1 %v4041_v55  ;;  %2626 = vmatmul.mubr.f32.gmra.mrb[26].mxu0 %v4583_v2 }
 0x111   : > { %2435 = vmatprep.mubr.f32.mxu1 %v4052_v8  ;;  %2627 = vmatprep.mubr.f32.mxu0 %v4035_v54 }
 0x114   : > { %2436 = vmatmul.mubr.f32.gmra.mrb[28].mxu1 %v4052_v8  ;;  %2628 = vmatmul.mubr.f32.gmra.mrb[28].mxu0 %v4035_v54 }
 0x115   : > { %2437 = vmatprep.mubr.f32.mxu1 %v4068_v48  ;;  %2629 = vmatprep.mubr.f32.mxu0 %v4055_v7 }
 0x118   : > { %2438 = vmatmul.mubr.f32.gmra.mrb[30].mxu1 %v4068_v48  ;;  %2630 = vmatmul.mubr.f32.gmra.mrb[30].mxu0 %v4055_v7 }
 0x1af   : > { %v1117_v28 = vpop.f32.mrb[0].mxu1  ;;  %v1855_v55 = vpop.f32.mrb[0].mxu0 }
 0x1b0   : > { %v2823_v62 = vadd.f32 %v1855_v55, %v1117_v28  ;;  %v1119_v15 = vpop.f32.mrb[1].mxu1  ;;  %v1857_v40 = vpop.f32.mrb[1].mxu0 }
 0x1b1   : > { %v2824_v46 = vadd.f32 %v1857_v40, %v1119_v15 }
 0x1b2   : > { %v1965_v36 = vmul.f32 0.5, %v2823_v62 }
 0x1b3   : > { %v1966_v18 = vmul.f32 0.5, %v2824_v46  ;;  %v1125_v33 = vpop.f32.mrb[2].mxu1  ;;  %v1862_v8 = vpop.f32.mrb[2].mxu0 }
 0x1b4   : > { %3040 = vtanh.f32 %v1965_v36  ;;  %v2825_v54 = vadd.f32 %v1862_v8, %v1125_v33  ;;  %v1127_v45 = vpop.f32.mrb[3].mxu1  ;;  %v1864_v44 = vpop.f32.mrb[3].mxu0 }
 0x1b5   : > { %3042 = vtanh.f32 %v1966_v18  ;;  %v2826_v3 = vadd.f32 %v1864_v44, %v1127_v45 }
 0x1b6   : > { %v1967_v48 = vmul.f32 0.5, %v2825_v54 }
 0x1b7   : > { %v1968_v11 = vmul.f32 0.5, %v2826_v3  ;;  %v1133_v7 = vpop.f32.mrb[4].mxu1  ;;  %v1869_v47 = vpop.f32.mrb[4].mxu0 }
 0x1b8   : > { %3044 = vtanh.f32 %v1967_v48  ;;  %v2827_v17 = vadd.f32 %v1869_v47, %v1133_v7  ;;  %v1135_v12 = vpop.f32.mrb[5].mxu1  ;;  %v1871_v23 = vpop.f32.mrb[5].mxu0 }
 0x1b9   : > { %3046 = vtanh.f32 %v1968_v11  ;;  %v2828_v16 = vadd.f32 %v1871_v23, %v1135_v12 }
 0x1ba   : > { %v1969_v21 = vmul.f32 0.5, %v2827_v17 }
 0x1bb   : > { %v1970_v59 = vmul.f32 0.5, %v2828_v16  ;;  %v1141_v51 = vpop.f32.mrb[6].mxu1  ;;  %v1876_v24 = vpop.f32.mrb[6].mxu0 }
 0x1bc   : > { %3048 = vtanh.f32 %v1969_v21  ;;  %v2829_v30 = vadd.f32 %v1876_v24, %v1141_v51  ;;  %v1143_v31 = vpop.f32.mrb[7].mxu1  ;;  %v1878_v25 = vpop.f32.mrb[7].mxu0 }
 0x1bd   : > { %3050 = vtanh.f32 %v1970_v59  ;;  %v2830_v61 = vadd.f32 %v1878_v25, %v1143_v31 }
 0x1be   : > { %v3041_v63 = vpop.eup %3040  ;;  %v1971_v4 = vmul.f32 0.5, %v2829_v30 }
 0x1bf   : > { %v3043_v0 = vpop.eup %3042  ;;  %v2029_v14 = vmul.f32 0.5, %v3041_v63  ;;  %v1972_v49 = vmul.f32 0.5, %v2830_v61  ;;  %v1149_v29 = vpop.f32.mrb[8].mxu1 }
 0x1c0   : > { %v1883_v26 = vpop.f32.mrb[8].mxu0  ;;  %v2030_v35 = vmul.f32 0.5, %v3043_v0  ;;  %3052 = vtanh.f32 %v1971_v4  ;;  %v1151_v39 = vpop.f32.mrb[9].mxu1 }
 0x1c1   : > { %v2831_v50 = vadd.f32 %v1883_v26, %v1149_v29  ;;  %v1885_v22 = vpop.f32.mrb[9].mxu0  ;;  %v2061_v34 = vadd.f32 0.5, %v2029_v14  ;;  %3054 = vtanh.f32 %v1972_v49 }
 0x1c2   : > { %v2832_v43 = vadd.f32 %v1885_v22, %v1151_v39  ;;  %v3045_v37 = vpop.eup %3044  ;;  %v2062_v9 = vadd.f32 0.5, %v2030_v35 }
 0x1c3   : > { %v1973_v52 = vmul.f32 0.5, %v2831_v50  ;;  %v3047_v2 = vpop.eup %3046  ;;  %2093 = vst [vmem:[%s4271_s20] sm:$0xff] %v2061_v34  ;;  %v2031_v1 = vmul.f32 0.5, %v3045_v37  ;;  %v1157_v60 = vpop.f32.mrb[10].mxu1 }
 0x1c4   : > { %v1974_v58 = vmul.f32 0.5, %v2832_v43  ;;  %v1890_v38 = vpop.f32.mrb[10].mxu0  ;;  %2094 = vst [vmem:[%s4271_s20 + $0x8] sm:$0xff] %v2062_v9  ;;  %v2032_v19 = vmul.f32 0.5, %v3047_v2  ;;  %v1159_v42 = vpop.f32.mrb[11].mxu1 }
 0x1c5   : > { %3056 = vtanh.f32 %v1973_v52  ;;  %v2833_v10 = vadd.f32 %v1890_v38, %v1157_v60  ;;  %v1892_v5 = vpop.f32.mrb[11].mxu0  ;;  %v2063_v27 = vadd.f32 0.5, %v2031_v1 }
 0x1c6   : > { %3058 = vtanh.f32 %v1974_v58  ;;  %v2834_v41 = vadd.f32 %v1892_v5, %v1159_v42  ;;  %v3049_v6 = vpop.eup %3048  ;;  %v2064_v53 = vadd.f32 0.5, %v2032_v19 }
 0x1c7   : > { %v1975_v56 = vmul.f32 0.5, %v2833_v10  ;;  %v3051_v20 = vpop.eup %3050  ;;  %2095 = vst [vmem:[%s4271_s20 + $0x10] sm:$0xff] %v2063_v27  ;;  %v2033_v13 = vmul.f32 0.5, %v3049_v6  ;;  %v1165_v32 = vpop.f32.mrb[12].mxu1 }
 0x1c8   : > { %v1976_v57 = vmul.f32 0.5, %v2834_v41  ;;  %v1897_v28 = vpop.f32.mrb[12].mxu0  ;;  %2096 = vst [vmem:[%s4271_s20 + $0x18] sm:$0xff] %v2064_v53  ;;  %v2034_v55 = vmul.f32 0.5, %v3051_v20  ;;  %v1167_v15 = vpop.f32.mrb[13].mxu1 }
 0x1c9   : > { %3060 = vtanh.f32 %v1975_v56  ;;  %v2835_v62 = vadd.f32 %v1897_v28, %v1165_v32  ;;  %v1899_v40 = vpop.f32.mrb[13].mxu0  ;;  %v2065_v46 = vadd.f32 0.5, %v2033_v13 }
 0x1ca   : > { %3062 = vtanh.f32 %v1976_v57  ;;  %v2836_v36 = vadd.f32 %v1899_v40, %v1167_v15  ;;  %v3053_v18 = vpop.eup %3052  ;;  %v2066_v33 = vadd.f32 0.5, %v2034_v55 }
 0x1cb   : > { %v1977_v8 = vmul.f32 0.5, %v2835_v62  ;;  %v3055_v54 = vpop.eup %3054  ;;  %2097 = vst [vmem:[%s4271_s20 + $0x20] sm:$0xff] %v2065_v46  ;;  %v2035_v45 = vmul.f32 0.5, %v3053_v18  ;;  %v1173_v3 = vpop.f32.mrb[14].mxu1 }
 0x1cc   : > { %v1978_v44 = vmul.f32 0.5, %v2836_v36  ;;  %v1904_v48 = vpop.f32.mrb[14].mxu0  ;;  %2098 = vst [vmem:[%s4271_s20 + $0x28] sm:$0xff] %v2066_v33  ;;  %v2036_v11 = vmul.f32 0.5, %v3055_v54  ;;  %v1175_v47 = vpop.f32.mrb[15].mxu1 }
 0x1cd   : > { %3064 = vtanh.f32 %v1977_v8  ;;  %v2837_v7 = vadd.f32 %v1904_v48, %v1173_v3  ;;  %v1906_v17 = vpop.f32.mrb[15].mxu0  ;;  %v2067_v12 = vadd.f32 0.5, %v2035_v45 }
 0x1ce   : > { %3066 = vtanh.f32 %v1978_v44  ;;  %v2838_v23 = vadd.f32 %v1906_v17, %v1175_v47  ;;  %v2068_v21 = vadd.f32 0.5, %v2036_v11 }
 0x1cf   : > { %v3057_v16 = vpop.eup %3056  ;;  %v1979_v59 = vmul.f32 0.5, %v2837_v7  ;;  %2099 = vst [vmem:[%s4271_s20 + $0x30] sm:$0xff] %v2067_v12  ;;  %v1181_v31 = vpop.f32.mrb[16].mxu1 }
 0x1d0   : > { %v3059_v51 = vpop.eup %3058  ;;  %v2037_v24 = vmul.f32 0.5, %v3057_v16  ;;  %v1980_v30 = vmul.f32 0.5, %v2838_v23  ;;  %v1911_v25 = vpop.f32.mrb[16].mxu0  ;;  %2100 = vst [vmem:[%s4271_s20 + $0x38] sm:$0xff] %v2068_v21 }
 0x1d1   : > { %v2038_v61 = vmul.f32 0.5, %v3059_v51  ;;  %3068 = vtanh.f32 %v1979_v59  ;;  %v2839_v63 = vadd.f32 %v1911_v25, %v1181_v31  ;;  %v1183_v4 = vpop.f32.mrb[17].mxu1  ;;  %v1913_v0 = vpop.f32.mrb[17].mxu0 }
 0x1d2   : > { %v2069_v14 = vadd.f32 0.5, %v2037_v24  ;;  %3070 = vtanh.f32 %v1980_v30  ;;  %v2840_v49 = vadd.f32 %v1913_v0, %v1183_v4 }
 0x1d3   : > { %v3061_v29 = vpop.eup %3060  ;;  %v2070_v26 = vadd.f32 0.5, %v2038_v61  ;;  %v1981_v35 = vmul.f32 0.5, %v2839_v63  ;;  %v1189_v34 = vpop.f32.mrb[18].mxu1 }
 0x1d4   : > { %v3063_v50 = vpop.eup %3062  ;;  %2101 = vst [vmem:[%s4271_s20 + $0x40] sm:$0xff] %v2069_v14  ;;  %v2039_v39 = vmul.f32 0.5, %v3061_v29  ;;  %v1982_v22 = vmul.f32 0.5, %v2840_v49  ;;  %v1918_v43 = vpop.f32.mrb[18].mxu0 }
 0x1d5   : > { %2102 = vst [vmem:[%s4271_s20 + $0x48] sm:$0xff] %v2070_v26  ;;  %v2040_v37 = vmul.f32 0.5, %v3063_v50  ;;  %3072 = vtanh.f32 %v1981_v35  ;;  %v2841_v9 = vadd.f32 %v1918_v43, %v1189_v34  ;;  %v1191_v52 = vpop.f32.mrb[19].mxu1  ;;  %v1920_v2 = vpop.f32.mrb[19].mxu0 }
 0x1d6   : > { %v2071_v1 = vadd.f32 0.5, %v2039_v39  ;;  %3074 = vtanh.f32 %v1982_v22  ;;  %v2842_v58 = vadd.f32 %v1920_v2, %v1191_v52 }
 0x1d7   : > { %v3065_v60 = vpop.eup %3064  ;;  %v2072_v38 = vadd.f32 0.5, %v2040_v37  ;;  %v1983_v19 = vmul.f32 0.5, %v2841_v9  ;;  %v1197_v27 = vpop.f32.mrb[20].mxu1 }
 0x1d8   : > { %v3067_v10 = vpop.eup %3066  ;;  %2103 = vst [vmem:[%s4271_s20 + $0x50] sm:$0xff] %v2071_v1  ;;  %v2041_v42 = vmul.f32 0.5, %v3065_v60  ;;  %v1984_v5 = vmul.f32 0.5, %v2842_v58  ;;  %v1925_v41 = vpop.f32.mrb[20].mxu0 }
 0x1d9   : > { %2104 = vst [vmem:[%s4271_s20 + $0x58] sm:$0xff] %v2072_v38  ;;  %v2042_v6 = vmul.f32 0.5, %v3067_v10  ;;  %3076 = vtanh.f32 %v1983_v19  ;;  %v2843_v53 = vadd.f32 %v1925_v41, %v1197_v27  ;;  %v1199_v56 = vpop.f32.mrb[21].mxu1  ;;  %v1927_v20 = vpop.f32.mrb[21].mxu0 }
 0x1da   : > { %v2073_v13 = vadd.f32 0.5, %v2041_v42  ;;  %3078 = vtanh.f32 %v1984_v5  ;;  %v2844_v57 = vadd.f32 %v1927_v20, %v1199_v56 }
 0x1db   : > { %v3069_v32 = vpop.eup %3068  ;;  %v2074_v28 = vadd.f32 0.5, %v2042_v6  ;;  %v1985_v55 = vmul.f32 0.5, %v2843_v53  ;;  %v1205_v46 = vpop.f32.mrb[22].mxu1 }
 0x1dc   : > { %v3071_v62 = vpop.eup %3070  ;;  %2105 = vst [vmem:[%s4271_s20 + $0x60] sm:$0xff] %v2073_v13  ;;  %v2043_v15 = vmul.f32 0.5, %v3069_v32  ;;  %v1986_v40 = vmul.f32 0.5, %v2844_v57  ;;  %v1932_v36 = vpop.f32.mrb[22].mxu0 }
 0x1dd   : > { %2106 = vst [vmem:[%s4271_s20 + $0x68] sm:$0xff] %v2074_v28  ;;  %v2044_v18 = vmul.f32 0.5, %v3071_v62  ;;  %3080 = vtanh.f32 %v1985_v55  ;;  %v2845_v33 = vadd.f32 %v1932_v36, %v1205_v46  ;;  %v1207_v8 = vpop.f32.mrb[23].mxu1  ;;  %v1934_v54 = vpop.f32.mrb[23].mxu0 }
 0x1de   : > { %v2075_v45 = vadd.f32 0.5, %v2043_v15  ;;  %3082 = vtanh.f32 %v1986_v40  ;;  %v2846_v44 = vadd.f32 %v1934_v54, %v1207_v8 }
 0x1df   : > { %v3073_v3 = vpop.eup %3072  ;;  %v2076_v48 = vadd.f32 0.5, %v2044_v18  ;;  %v1987_v11 = vmul.f32 0.5, %v2845_v33  ;;  %v1213_v12 = vpop.f32.mrb[24].mxu1 }
 0x1e0   : > { %v3075_v7 = vpop.eup %3074  ;;  %2107 = vst [vmem:[%s4271_s20 + $0x70] sm:$0xff] %v2075_v45  ;;  %v2045_v47 = vmul.f32 0.5, %v3073_v3  ;;  %v1988_v17 = vmul.f32 0.5, %v2846_v44  ;;  %v1939_v23 = vpop.f32.mrb[24].mxu0 }
 0x1e1   : > { %2108 = vst [vmem:[%s4271_s20 + $0x78] sm:$0xff] %v2076_v48  ;;  %v2046_v16 = vmul.f32 0.5, %v3075_v7  ;;  %3084 = vtanh.f32 %v1987_v11  ;;  %v2847_v21 = vadd.f32 %v1939_v23, %v1213_v12  ;;  %v1215_v59 = vpop.f32.mrb[25].mxu1  ;;  %v1941_v51 = vpop.f32.mrb[25].mxu0 }
 0x1e2   : > { %v2077_v24 = vadd.f32 0.5, %v2045_v47  ;;  %3086 = vtanh.f32 %v1988_v17  ;;  %v2848_v30 = vadd.f32 %v1941_v51, %v1215_v59 }
 0x1e3   : > { %v3077_v31 = vpop.eup %3076  ;;  %v2078_v25 = vadd.f32 0.5, %v2046_v16  ;;  %v1989_v61 = vmul.f32 0.5, %v2847_v21  ;;  %v1221_v14 = vpop.f32.mrb[26].mxu1 }
 0x1e4   : > { %v3079_v63 = vpop.eup %3078  ;;  %2109 = vst [vmem:[%s4271_s20 + $0x80] sm:$0xff] %v2077_v24  ;;  %v2047_v4 = vmul.f32 0.5, %v3077_v31  ;;  %v1990_v0 = vmul.f32 0.5, %v2848_v30  ;;  %v1946_v49 = vpop.f32.mrb[26].mxu0 }
 0x1e5   : > { %2110 = vst [vmem:[%s4271_s20 + $0x88] sm:$0xff] %v2078_v25  ;;  %v2048_v29 = vmul.f32 0.5, %v3079_v63  ;;  %3088 = vtanh.f32 %v1989_v61  ;;  %v2849_v26 = vadd.f32 %v1946_v49, %v1221_v14  ;;  %v1223_v35 = vpop.f32.mrb[27].mxu1  ;;  %v1948_v50 = vpop.f32.mrb[27].mxu0 }
 0x1e6   : > { %v2079_v39 = vadd.f32 0.5, %v2047_v4  ;;  %3090 = vtanh.f32 %v1990_v0  ;;  %v2850_v22 = vadd.f32 %v1948_v50, %v1223_v35 }
 0x1e7   : > { %v3081_v34 = vpop.eup %3080  ;;  %v2080_v43 = vadd.f32 0.5, %v2048_v29  ;;  %v1991_v37 = vmul.f32 0.5, %v2849_v26  ;;  %v1229_v1 = vpop.f32.mrb[28].mxu1 }
 0x1e8   : > { %v3083_v9 = vpop.eup %3082  ;;  %2111 = vst [vmem:[%s4271_s20 + $0x90] sm:$0xff] %v2079_v39  ;;  %v2049_v52 = vmul.f32 0.5, %v3081_v34  ;;  %v1992_v2 = vmul.f32 0.5, %v2850_v22  ;;  %v1953_v58 = vpop.f32.mrb[28].mxu0 }
 0x1e9   : > { %2112 = vst [vmem:[%s4271_s20 + $0x98] sm:$0xff] %v2080_v43  ;;  %v2050_v60 = vmul.f32 0.5, %v3083_v9  ;;  %3092 = vtanh.f32 %v1991_v37  ;;  %v2851_v38 = vadd.f32 %v1953_v58, %v1229_v1  ;;  %v1231_v19 = vpop.f32.mrb[29].mxu1  ;;  %v1955_v10 = vpop.f32.mrb[29].mxu0 }
 0x1ea   : > { %v2081_v42 = vadd.f32 0.5, %v2049_v52  ;;  %3094 = vtanh.f32 %v1992_v2  ;;  %v2852_v5 = vadd.f32 %v1955_v10, %v1231_v19 }
 0x1eb   : > { %v3085_v27 = vpop.eup %3084  ;;  %v2082_v41 = vadd.f32 0.5, %v2050_v60  ;;  %v1993_v6 = vmul.f32 0.5, %v2851_v38  ;;  %v1237_v13 = vpop.f32.mrb[30].mxu1 }
 0x1ec   : > { %v3087_v53 = vpop.eup %3086  ;;  %2113 = vst [vmem:[%s4271_s20 + $0xa0] sm:$0xff] %v2081_v42  ;;  %v2051_v56 = vmul.f32 0.5, %v3085_v27  ;;  %v1994_v20 = vmul.f32 0.5, %v2852_v5  ;;  %v1960_v57 = vpop.f32.mrb[30].mxu0 }
 0x1ed   : > { %2114 = vst [vmem:[%s4271_s20 + $0xa8] sm:$0xff] %v2082_v41  ;;  %v2052_v32 = vmul.f32 0.5, %v3087_v53  ;;  %3096 = vtanh.f32 %v1993_v6  ;;  %v2853_v28 = vadd.f32 %v1960_v57, %v1237_v13  ;;  %v1239_v55 = vpop.f32.mrb[31].mxu1  ;;  %v1962_v62 = vpop.f32.mrb[31].mxu0 }
 0x1ee   : > { %v2083_v15 = vadd.f32 0.5, %v2051_v56  ;;  %3098 = vtanh.f32 %v1994_v20  ;;  %v2854_v40 = vadd.f32 %v1962_v62, %v1239_v55 }
 0x1ef   : > { %v3089_v46 = vpop.eup %3088  ;;  %v2084_v36 = vadd.f32 0.5, %v2052_v32  ;;  %v1995_v18 = vmul.f32 0.5, %v2853_v28 }
 0x1f0   : > { %v3091_v33 = vpop.eup %3090  ;;  %2115 = vst [vmem:[%s4271_s20 + $0xb0] sm:$0xff] %v2083_v15  ;;  %v2053_v8 = vmul.f32 0.5, %v3089_v46  ;;  %v1996_v54 = vmul.f32 0.5, %v2854_v40 }
 0x1f1   : > { %2116 = vst [vmem:[%s4271_s20 + $0xb8] sm:$0xff] %v2084_v36  ;;  %v2054_v45 = vmul.f32 0.5, %v3091_v33  ;;  %3100 = vtanh.f32 %v1995_v18 }
 0x1f2   : > { %v2085_v44 = vadd.f32 0.5, %v2053_v8  ;;  %3102 = vtanh.f32 %v1996_v54 }
 0x1f3   : > { %v3093_v3 = vpop.eup %3092  ;;  %v2086_v48 = vadd.f32 0.5, %v2054_v45 }
 0x1f4   : > { %v3095_v11 = vpop.eup %3094  ;;  %2117 = vst [vmem:[%s4271_s20 + $0xc0] sm:$0xff] %v2085_v44  ;;  %v2055_v7 = vmul.f32 0.5, %v3093_v3 }
 0x1f5   : > { %2118 = vst [vmem:[%s4271_s20 + $0xc8] sm:$0xff] %v2086_v48  ;;  %v2056_v47 = vmul.f32 0.5, %v3095_v11 }
 0x1f6   : > { %v2087_v17 = vadd.f32 0.5, %v2055_v7 }
 0x1f7   : > { %v3097_v12 = vpop.eup %3096  ;;  %v2088_v23 = vadd.f32 0.5, %v2056_v47 }
 0x1f8   : > { %v3099_v16 = vpop.eup %3098  ;;  %2119 = vst [vmem:[%s4271_s20 + $0xd0] sm:$0xff] %v2087_v17  ;;  %v2057_v21 = vmul.f32 0.5, %v3097_v12 }
 0x1f9   : > { %2120 = vst [vmem:[%s4271_s20 + $0xd8] sm:$0xff] %v2088_v23  ;;  %v2058_v59 = vmul.f32 0.5, %v3099_v16 }
 0x1fa   : > { %v2089_v51 = vadd.f32 0.5, %v2057_v21 }
 0x1fb   : > { %v3101_v24 = vpop.eup %3100  ;;  %v2090_v30 = vadd.f32 0.5, %v2058_v59 }
 0x1fc   : > { %v3103_v31 = vpop.eup %3102  ;;  %2121 = vst [vmem:[%s4271_s20 + $0xe0] sm:$0xff] %v2089_v51  ;;  %v2059_v25 = vmul.f32 0.5, %v3101_v24 }
 0x1fd   : > { %2122 = vst [vmem:[%s4271_s20 + $0xe8] sm:$0xff] %v2090_v30  ;;  %v2060_v61 = vmul.f32 0.5, %v3103_v31 }
 0x1fe   : > { %v2091_v63 = vadd.f32 0.5, %v2059_v25 }
 0x1ff   : > { %v2092_v4 = vadd.f32 0.5, %v2060_v61 }
 0x200   : > { %2123 = vst [vmem:[%s4271_s20 + $0xf0] sm:$0xff] %v2091_v63 }
 0x201   : > { %2124 = vst [vmem:[%s4271_s20 + $0xf8] sm:$0xff] %v2092_v4 }
 0x202   : > { %3117 = shalt.err (!%p3114_p5)
}
 0x203   : > { %s3118_s5 = scalar_lea.hbm %s4308_s28, 4096  ;;  %s3122_s8 = scalar_lea.hbm %s4364_s2, 8192 }
 0x204   : > { %p3119_p6 = scmp.ne.s32.totalorder %s4308_s28, %s3118_s5  ;;  %p3123_p10 = scmp.lt.u32.totalorder %s4308_s28, %s4364_s2 }
 0x205   : > { %p3124_p11 = scmp.lt.u32.totalorder %s3122_s8, %s3118_s5  ;;  %p3126_p13 = scmp.lt.u32.totalorder %s3118_s5, %s4308_s28 }
 0x206   : > { %p3120_p7 = pnand %p3119_p6, %p3242_p4 }
 0x207   : > { %p3125_p12 = por %p3124_p11, %p3123_p10 }
 0x208   : > { %p3121_p9 = pneg %p3120_p7 }
 0x209   : > { %p3127_p0 = por %p3126_p13, %p3125_p12 }
 0x20b   : > { %p3128_p1 = pnand %p3127_p0, %p3121_p9 }
 0x20d   : > { %3131 = shalt.err (!%p3128_p1)
}
 0x20e   : > { %s3185_s27 = smov 256   ;;  %s3186_s18 = smov 16  }
 0x20f   : > { %2983 = dma.vmem_to_hbm [thread:$0]  (%p3242_p4), %s4310_s24, 4096, %s4308_s28, %s4316_s12, %s3185_s27, %s3185_s27, %s3186_s18  }
 0x210 PF: > { %p2989_p2 = scmp.ge.s32.totalorder %s3182_s14, 2  ;;  %s2157_s20 = sand.u32 1, %s3162_s9  }
 0x211   : > { %s2158_s23 = scalar_lea.sflag [#allocation3], %s2157_s20 }
 0x212   : > { %p2986_p3 = pnand %p2989_p2, %p3249_p8 }
 0x214   : > { %3157 = dma.done.wait (!%p2986_p3), %s2158_s23, 4096  }
 0x215   : > { %3159 = vsyncadd (!%p2986_p3), %s2158_s23, 4294963200  ;;  %s15_s14 = sadd.s32 1, %s3182_s14   ;;  %s4601_s9 = smov %s3166_s10 }
 0x216   : > { %p12_p5 = scmp.ge.s32.totalorder %s15_s14, 4   ;;  %s4602_s10 = smov %s3170_s11 }
 0x217   : > { %s4603_s11 = smov %s3255_s22  ;;  %s4604_s12 = smov %s3178_s13 }
 0x218   : > { %s4605_s13 = smov %s4607_s17  ;;  %14 = sbr.rel (!%p12_p5) target bundleno = 4 (0x4), region = 66 }
 0x21f   :  { %2163 = vsyncpa [#allocation3], 1 }
 0x220   :  { %2165 = vsyncpa [#allocation3 + $0x1], 1 }

</bundles_post_ra>
